<compile_context>
chip_gen: v6e
topology: v6e:2x2x1
jax: 0.10.0
libtpu: 0.0.40
codegen_flags: <defaults>
</compile_context>

<pallas_src>
import numpy as np
import jax
import jax.numpy as jnp
from jax.experimental import pallas as pl
from jax.experimental.pallas import tpu as pltpu


POOL_AFTER = (True, True, False, False, False, True)   # CharCNN conv1..conv6


def _round_up(x, m):
    return (x + m - 1) // m * m


# ------------------------------ fused Pallas kernel ------------------------------

def _make_fused_kernel(conv_cfg, num_channels, flat_positions, hidden, out_size):
    """conv_cfg: static tuple of (cin, cout, k, l_in, l_out, do_pool) per conv layer."""
    n_conv = len(conv_cfg)

    def kernel(*refs):
        x_ref = refs[0]                                   # (L0, E) f32 (batch elem)
        conv_refs = refs[1:1 + 2 * n_conv]                # w0,b0, w1,b1, ...
        l_refs = refs[1 + 2 * n_conv:1 + 2 * n_conv + 6]  # w1,b1,w2,b2,w3,b3
        o_ref = refs[1 + 2 * n_conv + 6]                  # (1, out_size)
        im_scr, pool_scr = refs[-2], refs[-1]             # VMEM scratch

        # Activations live as (length, channels): length -> sublanes, channels -> lanes.
        x = x_ref[...]                                    # (L0, E) f32
        for li, (cin, cout, k, l_in, l_out, do_pool) in enumerate(conv_cfg):
            w_ref = conv_refs[2 * li]                     # (k*cin, cout) bf16
            b_ref = conv_refs[2 * li + 1]                 # (1, cout) f32
            # im2col slab in VMEM scratch: slab[l, kk*cin + ci] = x[l + kk, ci]
            for kk in range(k):
                im_scr[0:l_out, kk * cin:(kk + 1) * cin] = x[kk:kk + l_out, :]
            slab = im_scr[0:l_out, 0:k * cin].astype(jnp.bfloat16)
            y = jnp.dot(slab, w_ref[...], preferred_element_type=jnp.float32)
            y = jnp.maximum(y + b_ref[...], 0.0)          # (l_out, cout) f32
            if do_pool:                                   # fused MaxPool1d(kernel=3, stride=3)
                n = l_out // 3
                pool_scr[0:l_out, :] = y
                p0 = pool_scr[pl.ds(0, n, stride=3), :]   # sublane-strided phase reads
                p1 = pool_scr[pl.ds(1, n, stride=3), :]
                p2 = pool_scr[pl.ds(2, n, stride=3), :]
                x = jnp.maximum(jnp.maximum(p0, p1), p2)  # (n, cout)
            else:
                x = y

        # MLP head (dropout = identity in eval).  `x` is (flat_positions, C);
        # PyTorch's view(B, -1) flatten order is folded into w1's row permutation.
        w1_ref, b1_ref, w2_ref, b2_ref, w3_ref, b3_ref = l_refs
        h = jnp.zeros((1, hidden), jnp.float32)
        for l in range(flat_positions):
            h = h + jnp.dot(x[l:l + 1, :].astype(jnp.bfloat16),
                            w1_ref[l * num_channels:(l + 1) * num_channels, :],
                            preferred_element_type=jnp.float32)
        h = jnp.maximum(h + b1_ref[...], 0.0)
        h = jnp.maximum(
            jnp.dot(h.astype(jnp.bfloat16), w2_ref[...],
                    preferred_element_type=jnp.float32) + b2_ref[...], 0.0)
        logits = jnp.dot(h.astype(jnp.bfloat16), w3_ref[...],
                         preferred_element_type=jnp.float32) + b3_ref[...]
        m = jnp.max(logits, axis=-1, keepdims=True)
        e = jnp.exp(logits - m)
        o_ref[...] = e / jnp.sum(e, axis=-1, keepdims=True)

    return kernel


# ------------------------------ one-time parameter prep ------------------------------

def prepare_params(params, num_channels, seq_len):
    """Hoisted, one-time weight re-layout (im2col layout, flatten-fold, bf16 cast)."""
    flat_positions = (seq_len - 96) // 27
    p = {"embedding": params["embedding"],
         "num_channels": num_channels,
         "flat_positions": flat_positions}

    conv = []
    for i in range(1, 7):
        w = params[f"c{i}_w"]                     # (Cout, Cin, K) PyTorch layout
        b = params[f"c{i}_b"]
        cout, cin, k = w.shape
        # rows ordered k-major then ci: wp[k*cin + ci, co] = w[co, ci, k]
        wp = jnp.transpose(w, (2, 1, 0)).reshape(k * cin, cout).astype(jnp.bfloat16)
        conv.append((wp, b.reshape(1, cout).astype(jnp.float32),
                     cin, cout, k, POOL_AFTER[i - 1]))
    p["conv"] = conv

    w1 = params["l1_w"]                           # (C*Lp, H), applied as x @ W + b
    f, h = w1.shape
    assert f == num_channels * flat_positions
    # w1p[l*C + c, :] = w1[c*Lp + l, :]  (folds the (C, Lp) flatten order)
    w1p = (w1.reshape(num_channels, flat_positions, h)
             .transpose(1, 0, 2).reshape(f, h)).astype(jnp.bfloat16)
    p["lin"] = [w1p, params["l1_b"].reshape(1, -1).astype(jnp.float32),
                params["l2_w"].astype(jnp.bfloat16),
                params["l2_b"].reshape(1, -1).astype(jnp.float32),
                params["l3_w"].astype(jnp.bfloat16),
                params["l3_b"].reshape(1, -1).astype(jnp.float32)]
    return p


# ------------------------------ forward wrapper ------------------------------

def char_cnn_forward(tokens, p):
    """tokens: (seq_len, batch) int32 ids.  p: output of prepare_params."""
    emb = p["embedding"][tokens]                              # (L, B, E)  glue gather
    x = jnp.transpose(emb, (1, 0, 2)).astype(jnp.float32)     # (B, L, E): per-batch (L, C)
    B, L, E = x.shape
    C = p["num_channels"]
    Lp = p["flat_positions"]
    H = p["lin"][0].shape[1]
    O = p["lin"][4].shape[1]

    conv_cfg = []
    l_in, max_lout, max_kcin = L, 1, 1
    for (wp, bp, cin, cout, k, do_pool) in p["conv"]:
        l_out = l_in - k + 1
        conv_cfg.append((cin, cout, k, l_in, l_out, do_pool))
        max_lout = max(max_lout, l_out)
        max_kcin = max(max_kcin, k * cin)
        l_in = l_out // 3 if do_pool else l_out
    assert l_in == Lp

    kernel = _make_fused_kernel(tuple(conv_cfg), C, Lp, H, O)

    inputs = [x]
    in_specs = [pl.BlockSpec((None, L, E), lambda b: (b, 0, 0))]
    for (wp, bp, *_rest) in p["conv"]:
        inputs += [wp, bp]
        in_specs += [pl.BlockSpec(wp.shape, lambda b: (0, 0)),
                     pl.BlockSpec(bp.shape, lambda b: (0, 0))]
    for arr in p["lin"]:
        inputs.append(arr)
        in_specs.append(pl.BlockSpec(arr.shape, lambda b: (0, 0)))

    out = pl.pallas_call(
        kernel,
        out_shape=jax.ShapeDtypeStruct((B, 1, O), jnp.float32),
        grid=(B,),
        in_specs=in_specs,
        out_specs=pl.BlockSpec((None, 1, O), lambda b: (b, 0, 0)),
        scratch_shapes=[
            pltpu.VMEM((_round_up(max_lout, 8), _round_up(max_kcin, 128)), jnp.float32),
            pltpu.VMEM((_round_up(max_lout, 8), C), jnp.float32),
        ],
        compiler_params=pltpu.CompilerParams(
            dimension_semantics=("parallel",)),   # v7x: shard batch across both TCs
    )(*inputs)
    return out.reshape(B, O)


# ------------------------------ reference (pure JAX, f32) ------------------------------

def reference_forward(tokens, params):
    emb = params["embedding"][tokens]
    x = jnp.transpose(emb, (1, 2, 0)).astype(jnp.float32)     # (B, E, L) NCL
    hp = jax.lax.Precision.HIGHEST

    def conv(x, w, b):
        y = jax.lax.conv_general_dilated(
            x, w, window_strides=(1,), padding="VALID",
            dimension_numbers=("NCH", "OIH", "NCH"), precision=hp)
        return jax.nn.relu(y + b[None, :, None])

    def pool(y):
        B, C, L = y.shape
        n = L // 3
        return jnp.max(y[:, :, :3 * n].reshape(B, C, n, 3), axis=-1)

    x = pool(conv(x, params["c1_w"], params["c1_b"]))
    x = pool(conv(x, params["c2_w"], params["c2_b"]))
    x = conv(x, params["c3_w"], params["c3_b"])
    x = conv(x, params["c4_w"], params["c4_b"])
    x = conv(x, params["c5_w"], params["c5_b"])
    x = pool(conv(x, params["c6_w"], params["c6_b"]))
    flat = x.reshape(x.shape[0], -1)
    h = jax.nn.relu(jnp.dot(flat, params["l1_w"], precision=hp) + params["l1_b"])
    h = jax.nn.relu(jnp.dot(h, params["l2_w"], precision=hp) + params["l2_b"])
    return jax.nn.softmax(jnp.dot(h, params["l3_w"], precision=hp) + params["l3_b"], axis=-1)


# ------------------------------ deterministic params ------------------------------

def init_params(key, vocab, emb, C, seq_len, linear_size, out_size):
    ks = iter(jax.random.split(key, 20))

    def dense(shape, fan_in):
        return jax.random.normal(next(ks), shape, jnp.float32) / np.sqrt(fan_in)

    p = {"embedding": jax.random.normal(next(ks), (vocab, emb), jnp.float32)}
    conv_defs = [(emb, C, 7), (C, C, 7), (C, C, 3), (C, C, 3), (C, C, 3), (C, C, 3)]
    for i, (cin, cout, k) in enumerate(conv_defs, 1):
        p[f"c{i}_w"] = dense((cout, cin, k), cin * k)     # PyTorch (Cout, Cin, K)
        p[f"c{i}_b"] = 0.1 * dense((cout,), 1.0)
    feat = C * ((seq_len - 96) // 27)                     # conv_output_size
    lin_defs = [(feat, linear_size), (linear_size, linear_size), (linear_size, out_size)]
    for i, (fin, fout) in enumerate(lin_defs, 1):
        p[f"l{i}_w"] = dense((fin, fout), fin)            # stored (in, out): x @ W + b
        p[f"l{i}_b"] = 0.1 * dense((fout,), 1.0)
    return p


if __name__ == "__main__":
    SEQ_LEN, BATCH = 150, 2        # (150 - 96) // 27 = 2 flattened positions
    VOCAB, EMB = 50, 8
    NUM_CHANNELS, LINEAR_SIZE, OUTPUT_SIZE = 16, 32, 4

    key = jax.random.PRNGKey(0)
    pkey, xkey = jax.random.split(key)
    params = init_params(pkey, VOCAB, EMB, NUM_CHANNELS, SEQ_LEN, LINEAR_SIZE, OUTPUT_SIZE)
    tokens = jax.random.randint(xkey, (SEQ_LEN, BATCH), 0, VOCAB, dtype=jnp.int32)

    prepped = prepare_params(params, NUM_CHANNELS, SEQ_LEN)   # one-time layout prep
    out = jax.block_until_ready(char_cnn_forward(tokens, prepped))
    ref = jax.block_until_ready(reference_forward(tokens, params))

    assert out.shape == (BATCH, OUTPUT_SIZE)
    # Kernel uses bf16 MXU inputs with f32 accumulation; compare against an f32
    # (HIGHEST-precision) reference with a tolerance covering bf16 rounding.
    np.testing.assert_allclose(np.asarray(out), np.asarray(ref), atol=2e-2, rtol=0)
    np.testing.assert_allclose(np.asarray(out).sum(-1), 1.0, atol=1e-4)
    print("KERNEL_OK")
</pallas_src>

<mosaic_0001>
module attributes {stable_mosaic.version = 11 : i64} {
  func.func @kernel(%arg0: i32, %arg1: memref<1x150x8xf32, #tpu.memory_space<vmem>>, %arg2: memref<56x16xbf16, #tpu.memory_space<vmem>>, %arg3: memref<1x16xf32, #tpu.memory_space<vmem>>, %arg4: memref<112x16xbf16, #tpu.memory_space<vmem>>, %arg5: memref<1x16xf32, #tpu.memory_space<vmem>>, %arg6: memref<48x16xbf16, #tpu.memory_space<vmem>>, %arg7: memref<1x16xf32, #tpu.memory_space<vmem>>, %arg8: memref<48x16xbf16, #tpu.memory_space<vmem>>, %arg9: memref<1x16xf32, #tpu.memory_space<vmem>>, %arg10: memref<48x16xbf16, #tpu.memory_space<vmem>>, %arg11: memref<1x16xf32, #tpu.memory_space<vmem>>, %arg12: memref<48x16xbf16, #tpu.memory_space<vmem>>, %arg13: memref<1x16xf32, #tpu.memory_space<vmem>>, %arg14: memref<32x32xbf16, #tpu.memory_space<vmem>>, %arg15: memref<1x32xf32, #tpu.memory_space<vmem>>, %arg16: memref<32x32xbf16, #tpu.memory_space<vmem>>, %arg17: memref<1x32xf32, #tpu.memory_space<vmem>>, %arg18: memref<32x4xbf16, #tpu.memory_space<vmem>>, %arg19: memref<1x4xf32, #tpu.memory_space<vmem>>, %arg20: memref<1x1x4xf32, #tpu.memory_space<vmem>>, %arg21: memref<144x128xf32, #tpu.memory_space<vmem>>, %arg22: memref<144x16xf32, #tpu.memory_space<vmem>>) attributes {dimension_semantics = [#tpu.dimension_semantics<parallel>], iteration_bounds = array<i64: 2>, scalar_prefetch = 0 : i64, scratch_operands = 2 : i64, tpu.core_type = #tpu.core_type<tc>, window_params = [{transform_indices = @transform_0, window_bounds = array<i64: 1, 150, 8>}, {pipeline_mode = #tpu.pipeline_mode<synchronous>, transform_indices = @transform_1, window_bounds = array<i64: 56, 16>}, {pipeline_mode = #tpu.pipeline_mode<synchronous>, transform_indices = @transform_2, window_bounds = array<i64: 1, 16>}, {pipeline_mode = #tpu.pipeline_mode<synchronous>, transform_indices = @transform_3, window_bounds = array<i64: 112, 16>}, {pipeline_mode = #tpu.pipeline_mode<synchronous>, transform_indices = @transform_4, window_bounds = array<i64: 1, 16>}, {pipeline_mode = #tpu.pipeline_mode<synchronous>, transform_indices = @transform_5, window_bounds = array<i64: 48, 16>}, {pipeline_mode = #tpu.pipeline_mode<synchronous>, transform_indices = @transform_6, window_bounds = array<i64: 1, 16>}, {pipeline_mode = #tpu.pipeline_mode<synchronous>, transform_indices = @transform_7, window_bounds = array<i64: 48, 16>}, {pipeline_mode = #tpu.pipeline_mode<synchronous>, transform_indices = @transform_8, window_bounds = array<i64: 1, 16>}, {pipeline_mode = #tpu.pipeline_mode<synchronous>, transform_indices = @transform_9, window_bounds = array<i64: 48, 16>}, {pipeline_mode = #tpu.pipeline_mode<synchronous>, transform_indices = @transform_10, window_bounds = array<i64: 1, 16>}, {pipeline_mode = #tpu.pipeline_mode<synchronous>, transform_indices = @transform_11, window_bounds = array<i64: 48, 16>}, {pipeline_mode = #tpu.pipeline_mode<synchronous>, transform_indices = @transform_12, window_bounds = array<i64: 1, 16>}, {pipeline_mode = #tpu.pipeline_mode<synchronous>, transform_indices = @transform_13, window_bounds = array<i64: 32, 32>}, {pipeline_mode = #tpu.pipeline_mode<synchronous>, transform_indices = @transform_14, window_bounds = array<i64: 1, 32>}, {pipeline_mode = #tpu.pipeline_mode<synchronous>, transform_indices = @transform_15, window_bounds = array<i64: 32, 32>}, {pipeline_mode = #tpu.pipeline_mode<synchronous>, transform_indices = @transform_16, window_bounds = array<i64: 1, 32>}, {pipeline_mode = #tpu.pipeline_mode<synchronous>, transform_indices = @transform_17, window_bounds = array<i64: 32, 4>}, {pipeline_mode = #tpu.pipeline_mode<synchronous>, transform_indices = @transform_18, window_bounds = array<i64: 1, 4>}, {transform_indices = @transform_19, window_bounds = array<i64: 1, 1, 4>}]} {
    %c0 = arith.constant 0 : index
    %c0_0 = arith.constant 0 : index
    %c0_1 = arith.constant 0 : index
    %0 = vector.load %arg1[%c0, %c0_0, %c0_1] : memref<1x150x8xf32, #tpu.memory_space<vmem>>, vector<1x150x8xf32>
    %1 = vector.shape_cast %0 : vector<1x150x8xf32> to vector<150x8xf32>
    %2 = vector.extract_strided_slice %1 {offsets = [0, 0], sizes = [144, 8], strides = [1, 1]} : vector<150x8xf32> to vector<144x8xf32>
    %c0_2 = arith.constant 0 : index
    %c0_3 = arith.constant 0 : index
    %3 = vector.load %arg21[%c0_2, %c0_3] : memref<144x128xf32, #tpu.memory_space<vmem>>, vector<144x8xf32>
    tpu.vector_store %arg21[%c0_2, %c0_3], %2 {strides = array<i32>} : memref<144x128xf32, #tpu.memory_space<vmem>>, vector<144x8xf32>,
    %4 = vector.extract_strided_slice %1 {offsets = [1, 0], sizes = [144, 8], strides = [1, 1]} : vector<150x8xf32> to vector<144x8xf32>
    %c0_4 = arith.constant 0 : index
    %c8 = arith.constant 8 : index
    %5 = vector.load %arg21[%c0_4, %c8] : memref<144x128xf32, #tpu.memory_space<vmem>>, vector<144x8xf32>
    tpu.vector_store %arg21[%c0_4, %c8], %4 {strides = array<i32>} : memref<144x128xf32, #tpu.memory_space<vmem>>, vector<144x8xf32>,
    %6 = vector.extract_strided_slice %1 {offsets = [2, 0], sizes = [144, 8], strides = [1, 1]} : vector<150x8xf32> to vector<144x8xf32>
    %c0_5 = arith.constant 0 : index
    %c16 = arith.constant 16 : index
    %7 = vector.load %arg21[%c0_5, %c16] : memref<144x128xf32, #tpu.memory_space<vmem>>, vector<144x8xf32>
    tpu.vector_store %arg21[%c0_5, %c16], %6 {strides = array<i32>} : memref<144x128xf32, #tpu.memory_space<vmem>>, vector<144x8xf32>,
    %8 = vector.extract_strided_slice %1 {offsets = [3, 0], sizes = [144, 8], strides = [1, 1]} : vector<150x8xf32> to vector<144x8xf32>
    %c0_6 = arith.constant 0 : index
    %c24 = arith.constant 24 : index
    %9 = vector.load %arg21[%c0_6, %c24] : memref<144x128xf32, #tpu.memory_space<vmem>>, vector<144x8xf32>
    tpu.vector_store %arg21[%c0_6, %c24], %8 {strides = array<i32>} : memref<144x128xf32, #tpu.memory_space<vmem>>, vector<144x8xf32>,
    %10 = vector.extract_strided_slice %1 {offsets = [4, 0], sizes = [144, 8], strides = [1, 1]} : vector<150x8xf32> to vector<144x8xf32>
    %c0_7 = arith.constant 0 : index
    %c32 = arith.constant 32 : index
    %11 = vector.load %arg21[%c0_7, %c32] : memref<144x128xf32, #tpu.memory_space<vmem>>, vector<144x8xf32>
    tpu.vector_store %arg21[%c0_7, %c32], %10 {strides = array<i32>} : memref<144x128xf32, #tpu.memory_space<vmem>>, vector<144x8xf32>,
    %12 = vector.extract_strided_slice %1 {offsets = [5, 0], sizes = [144, 8], strides = [1, 1]} : vector<150x8xf32> to vector<144x8xf32>
    %c0_8 = arith.constant 0 : index
    %c40 = arith.constant 40 : index
    %13 = vector.load %arg21[%c0_8, %c40] : memref<144x128xf32, #tpu.memory_space<vmem>>, vector<144x8xf32>
    tpu.vector_store %arg21[%c0_8, %c40], %12 {strides = array<i32>} : memref<144x128xf32, #tpu.memory_space<vmem>>, vector<144x8xf32>,
    %14 = vector.extract_strided_slice %1 {offsets = [6, 0], sizes = [144, 8], strides = [1, 1]} : vector<150x8xf32> to vector<144x8xf32>
    %c0_9 = arith.constant 0 : index
    %c48 = arith.constant 48 : index
    %15 = vector.load %arg21[%c0_9, %c48] : memref<144x128xf32, #tpu.memory_space<vmem>>, vector<144x8xf32>
    tpu.vector_store %arg21[%c0_9, %c48], %14 {strides = array<i32>} : memref<144x128xf32, #tpu.memory_space<vmem>>, vector<144x8xf32>,
    %c0_10 = arith.constant 0 : index
    %c0_11 = arith.constant 0 : index
    %16 = vector.load %arg21[%c0_10, %c0_11] : memref<144x128xf32, #tpu.memory_space<vmem>>, vector<144x56xf32>
    %17 = arith.truncf %16 : vector<144x56xf32> to vector<144x56xbf16>
    %c0_12 = arith.constant 0 : index
    %c0_13 = arith.constant 0 : index
    %18 = vector.load %arg2[%c0_12, %c0_13] : memref<56x16xbf16, #tpu.memory_space<vmem>>, vector<56x16xbf16>
    %cst = arith.constant dense<0.000000e+00> : vector<144x16xf32>
    %19 = tpu.matmul %17, %18, %cst {dimension_numbers = #tpu.dot_dimension_numbers<[1], [0], [0], [1], [0, 0, 1, 1], [], []>} : vector<144x56xbf16>, vector<56x16xbf16>, vector<144x16xf32> -> vector<144x16xf32>
    %c0_14 = arith.constant 0 : index
    %c0_15 = arith.constant 0 : index
    %20 = vector.load %arg3[%c0_14, %c0_15] : memref<1x16xf32, #tpu.memory_space<vmem>>, vector<1x16xf32>
    %21 = vector.broadcast %20 : vector<1x16xf32> to vector<144x16xf32>
    %22 = arith.addf %19, %21 : vector<144x16xf32>
    %cst_16 = arith.constant 0.000000e+00 : f32
    %23 = vector.broadcast %cst_16 : f32 to vector<144x16xf32>
    %24 = arith.maximumf %22, %23 : vector<144x16xf32>
    %c0_17 = arith.constant 0 : index
    %c0_18 = arith.constant 0 : index
    %25 = vector.load %arg22[%c0_17, %c0_18] : memref<144x16xf32, #tpu.memory_space<vmem>>, vector<144x16xf32>
    tpu.vector_store %arg22[%c0_17, %c0_18], %24 {strides = array<i32>} : memref<144x16xf32, #tpu.memory_space<vmem>>, vector<144x16xf32>,
    %c0_19 = arith.constant 0 : index
    %c0_20 = arith.constant 0 : index
    %26 = tpu.strided_load %arg22[%c0_19, %c0_20] {strides = array<i32: 3, 1>} : memref<144x16xf32, #tpu.memory_space<vmem>>, vector<48x16xf32>
    %c1 = arith.constant 1 : index
    %c0_21 = arith.constant 0 : index
    %27 = tpu.strided_load %arg22[%c1, %c0_21] {strides = array<i32: 3, 1>} : memref<144x16xf32, #tpu.memory_space<vmem>>, vector<48x16xf32>
    %c2 = arith.constant 2 : index
    %c0_22 = arith.constant 0 : index
    %28 = tpu.strided_load %arg22[%c2, %c0_22] {strides = array<i32: 3, 1>} : memref<144x16xf32, #tpu.memory_space<vmem>>, vector<48x16xf32>
    %29 = arith.maximumf %26, %27 : vector<48x16xf32>
    %30 = arith.maximumf %29, %28 : vector<48x16xf32>
    %31 = vector.extract_strided_slice %30 {offsets = [0, 0], sizes = [42, 16], strides = [1, 1]} : vector<48x16xf32> to vector<42x16xf32>
    %c0_23 = arith.constant 0 : index
    %c0_24 = arith.constant 0 : index
    %32 = vector.load %arg21[%c0_23, %c0_24] : memref<144x128xf32, #tpu.memory_space<vmem>>, vector<42x16xf32>
    tpu.vector_store %arg21[%c0_23, %c0_24], %31 {strides = array<i32>} : memref<144x128xf32, #tpu.memory_space<vmem>>, vector<42x16xf32>,
    %33 = vector.extract_strided_slice %30 {offsets = [1, 0], sizes = [42, 16], strides = [1, 1]} : vector<48x16xf32> to vector<42x16xf32>
    %c0_25 = arith.constant 0 : index
    %c16_26 = arith.constant 16 : index
    %34 = vector.load %arg21[%c0_25, %c16_26] : memref<144x128xf32, #tpu.memory_space<vmem>>, vector<42x16xf32>
    tpu.vector_store %arg21[%c0_25, %c16_26], %33 {strides = array<i32>} : memref<144x128xf32, #tpu.memory_space<vmem>>, vector<42x16xf32>,
    %35 = vector.extract_strided_slice %30 {offsets = [2, 0], sizes = [42, 16], strides = [1, 1]} : vector<48x16xf32> to vector<42x16xf32>
    %c0_27 = arith.constant 0 : index
    %c32_28 = arith.constant 32 : index
    %36 = vector.load %arg21[%c0_27, %c32_28] : memref<144x128xf32, #tpu.memory_space<vmem>>, vector<42x16xf32>
    tpu.vector_store %arg21[%c0_27, %c32_28], %35 {strides = array<i32>} : memref<144x128xf32, #tpu.memory_space<vmem>>, vector<42x16xf32>,
    %37 = vector.extract_strided_slice %30 {offsets = [3, 0], sizes = [42, 16], strides = [1, 1]} : vector<48x16xf32> to vector<42x16xf32>
    %c0_29 = arith.constant 0 : index
    %c48_30 = arith.constant 48 : index
    %38 = vector.load %arg21[%c0_29, %c48_30] : memref<144x128xf32, #tpu.memory_space<vmem>>, vector<42x16xf32>
    tpu.vector_store %arg21[%c0_29, %c48_30], %37 {strides = array<i32>} : memref<144x128xf32, #tpu.memory_space<vmem>>, vector<42x16xf32>,
    %39 = vector.extract_strided_slice %30 {offsets = [4, 0], sizes = [42, 16], strides = [1, 1]} : vector<48x16xf32> to vector<42x16xf32>
    %c0_31 = arith.constant 0 : index
    %c64 = arith.constant 64 : index
    %40 = vector.load %arg21[%c0_31, %c64] : memref<144x128xf32, #tpu.memory_space<vmem>>, vector<42x16xf32>
    tpu.vector_store %arg21[%c0_31, %c64], %39 {strides = array<i32>} : memref<144x128xf32, #tpu.memory_space<vmem>>, vector<42x16xf32>,
    %41 = vector.extract_strided_slice %30 {offsets = [5, 0], sizes = [42, 16], strides = [1, 1]} : vector<48x16xf32> to vector<42x16xf32>
    %c0_32 = arith.constant 0 : index
    %c80 = arith.constant 80 : index
    %42 = vector.load %arg21[%c0_32, %c80] : memref<144x128xf32, #tpu.memory_space<vmem>>, vector<42x16xf32>
    tpu.vector_store %arg21[%c0_32, %c80], %41 {strides = array<i32>} : memref<144x128xf32, #tpu.memory_space<vmem>>, vector<42x16xf32>,
    %43 = vector.extract_strided_slice %30 {offsets = [6, 0], sizes = [42, 16], strides = [1, 1]} : vector<48x16xf32> to vector<42x16xf32>
    %c0_33 = arith.constant 0 : index
    %c96 = arith.constant 96 : index
    %44 = vector.load %arg21[%c0_33, %c96] : memref<144x128xf32, #tpu.memory_space<vmem>>, vector<42x16xf32>
    tpu.vector_store %arg21[%c0_33, %c96], %43 {strides = array<i32>} : memref<144x128xf32, #tpu.memory_space<vmem>>, vector<42x16xf32>,
    %c0_34 = arith.constant 0 : index
    %c0_35 = arith.constant 0 : index
    %45 = vector.load %arg21[%c0_34, %c0_35] : memref<144x128xf32, #tpu.memory_space<vmem>>, vector<42x112xf32>
    %46 = arith.truncf %45 : vector<42x112xf32> to vector<42x112xbf16>
    %c0_36 = arith.constant 0 : index
    %c0_37 = arith.constant 0 : index
    %47 = vector.load %arg4[%c0_36, %c0_37] : memref<112x16xbf16, #tpu.memory_space<vmem>>, vector<112x16xbf16>
    %cst_38 = arith.constant dense<0.000000e+00> : vector<42x16xf32>
    %48 = tpu.matmul %46, %47, %cst_38 {dimension_numbers = #tpu.dot_dimension_numbers<[1], [0], [0], [1], [0, 0, 1, 1], [], []>} : vector<42x112xbf16>, vector<112x16xbf16>, vector<42x16xf32> -> vector<42x16xf32>
    %c0_39 = arith.constant 0 : index
    %c0_40 = arith.constant 0 : index
    %49 = vector.load %arg5[%c0_39, %c0_40] : memref<1x16xf32, #tpu.memory_space<vmem>>, vector<1x16xf32>
    %50 = vector.broadcast %49 : vector<1x16xf32> to vector<42x16xf32>
    %51 = arith.addf %48, %50 : vector<42x16xf32>
    %cst_41 = arith.constant 0.000000e+00 : f32
    %52 = vector.broadcast %cst_41 : f32 to vector<42x16xf32>
    %53 = arith.maximumf %51, %52 : vector<42x16xf32>
    %c0_42 = arith.constant 0 : index
    %c0_43 = arith.constant 0 : index
    %54 = vector.load %arg22[%c0_42, %c0_43] : memref<144x16xf32, #tpu.memory_space<vmem>>, vector<42x16xf32>
    tpu.vector_store %arg22[%c0_42, %c0_43], %53 {strides = array<i32>} : memref<144x16xf32, #tpu.memory_space<vmem>>, vector<42x16xf32>,
    %c0_44 = arith.constant 0 : index
    %c0_45 = arith.constant 0 : index
    %55 = tpu.strided_load %arg22[%c0_44, %c0_45] {strides = array<i32: 3, 1>} : memref<144x16xf32, #tpu.memory_space<vmem>>, vector<14x16xf32>
    %c1_46 = arith.constant 1 : index
    %c0_47 = arith.constant 0 : index
    %56 = tpu.strided_load %arg22[%c1_46, %c0_47] {strides = array<i32: 3, 1>} : memref<144x16xf32, #tpu.memory_space<vmem>>, vector<14x16xf32>
    %c2_48 = arith.constant 2 : index
    %c0_49 = arith.constant 0 : index
    %57 = tpu.strided_load %arg22[%c2_48, %c0_49] {strides = array<i32: 3, 1>} : memref<144x16xf32, #tpu.memory_space<vmem>>, vector<14x16xf32>
    %58 = arith.maximumf %55, %56 : vector<14x16xf32>
    %59 = arith.maximumf %58, %57 : vector<14x16xf32>
    %60 = vector.extract_strided_slice %59 {offsets = [0, 0], sizes = [12, 16], strides = [1, 1]} : vector<14x16xf32> to vector<12x16xf32>
    %c0_50 = arith.constant 0 : index
    %c0_51 = arith.constant 0 : index
    %61 = vector.load %arg21[%c0_50, %c0_51] : memref<144x128xf32, #tpu.memory_space<vmem>>, vector<12x16xf32>
    tpu.vector_store %arg21[%c0_50, %c0_51], %60 {strides = array<i32>} : memref<144x128xf32, #tpu.memory_space<vmem>>, vector<12x16xf32>,
    %62 = vector.extract_strided_slice %59 {offsets = [1, 0], sizes = [12, 16], strides = [1, 1]} : vector<14x16xf32> to vector<12x16xf32>
    %c0_52 = arith.constant 0 : index
    %c16_53 = arith.constant 16 : index
    %63 = vector.load %arg21[%c0_52, %c16_53] : memref<144x128xf32, #tpu.memory_space<vmem>>, vector<12x16xf32>
    tpu.vector_store %arg21[%c0_52, %c16_53], %62 {strides = array<i32>} : memref<144x128xf32, #tpu.memory_space<vmem>>, vector<12x16xf32>,
    %64 = vector.extract_strided_slice %59 {offsets = [2, 0], sizes = [12, 16], strides = [1, 1]} : vector<14x16xf32> to vector<12x16xf32>
    %c0_54 = arith.constant 0 : index
    %c32_55 = arith.constant 32 : index
    %65 = vector.load %arg21[%c0_54, %c32_55] : memref<144x128xf32, #tpu.memory_space<vmem>>, vector<12x16xf32>
    tpu.vector_store %arg21[%c0_54, %c32_55], %64 {strides = array<i32>} : memref<144x128xf32, #tpu.memory_space<vmem>>, vector<12x16xf32>,
    %c0_56 = arith.constant 0 : index
    %c0_57 = arith.constant 0 : index
    %66 = vector.load %arg21[%c0_56, %c0_57] : memref<144x128xf32, #tpu.memory_space<vmem>>, vector<12x48xf32>
    %67 = arith.truncf %66 : vector<12x48xf32> to vector<12x48xbf16>
    %c0_58 = arith.constant 0 : index
    %c0_59 = arith.constant 0 : index
    %68 = vector.load %arg6[%c0_58, %c0_59] : memref<48x16xbf16, #tpu.memory_space<vmem>>, vector<48x16xbf16>
    %cst_60 = arith.constant dense<0.000000e+00> : vector<12x16xf32>
    %69 = tpu.matmul %67, %68, %cst_60 {dimension_numbers = #tpu.dot_dimension_numbers<[1], [0], [0], [1], [0, 0, 1, 1], [], []>} : vector<12x48xbf16>, vector<48x16xbf16>, vector<12x16xf32> -> vector<12x16xf32>
    %c0_61 = arith.constant 0 : index
    %c0_62 = arith.constant 0 : index
    %70 = vector.load %arg7[%c0_61, %c0_62] : memref<1x16xf32, #tpu.memory_space<vmem>>, vector<1x16xf32>
    %71 = vector.broadcast %70 : vector<1x16xf32> to vector<12x16xf32>
    %72 = arith.addf %69, %71 : vector<12x16xf32>
    %cst_63 = arith.constant 0.000000e+00 : f32
    %73 = vector.broadcast %cst_63 : f32 to vector<12x16xf32>
    %74 = arith.maximumf %72, %73 : vector<12x16xf32>
    %75 = vector.extract_strided_slice %74 {offsets = [0, 0], sizes = [10, 16], strides = [1, 1]} : vector<12x16xf32> to vector<10x16xf32>
    %c0_64 = arith.constant 0 : index
    %c0_65 = arith.constant 0 : index
    %76 = vector.load %arg21[%c0_64, %c0_65] : memref<144x128xf32, #tpu.memory_space<vmem>>, vector<10x16xf32>
    tpu.vector_store %arg21[%c0_64, %c0_65], %75 {strides = array<i32>} : memref<144x128xf32, #tpu.memory_space<vmem>>, vector<10x16xf32>,
    %77 = vector.extract_strided_slice %74 {offsets = [1, 0], sizes = [10, 16], strides = [1, 1]} : vector<12x16xf32> to vector<10x16xf32>
    %c0_66 = arith.constant 0 : index
    %c16_67 = arith.constant 16 : index
    %78 = vector.load %arg21[%c0_66, %c16_67] : memref<144x128xf32, #tpu.memory_space<vmem>>, vector<10x16xf32>
    tpu.vector_store %arg21[%c0_66, %c16_67], %77 {strides = array<i32>} : memref<144x128xf32, #tpu.memory_space<vmem>>, vector<10x16xf32>,
    %79 = vector.extract_strided_slice %74 {offsets = [2, 0], sizes = [10, 16], strides = [1, 1]} : vector<12x16xf32> to vector<10x16xf32>
    %c0_68 = arith.constant 0 : index
    %c32_69 = arith.constant 32 : index
    %80 = vector.load %arg21[%c0_68, %c32_69] : memref<144x128xf32, #tpu.memory_space<vmem>>, vector<10x16xf32>
    tpu.vector_store %arg21[%c0_68, %c32_69], %79 {strides = array<i32>} : memref<144x128xf32, #tpu.memory_space<vmem>>, vector<10x16xf32>,
    %c0_70 = arith.constant 0 : index
    %c0_71 = arith.constant 0 : index
    %81 = vector.load %arg21[%c0_70, %c0_71] : memref<144x128xf32, #tpu.memory_space<vmem>>, vector<10x48xf32>
    %82 = arith.truncf %81 : vector<10x48xf32> to vector<10x48xbf16>
    %c0_72 = arith.constant 0 : index
    %c0_73 = arith.constant 0 : index
    %83 = vector.load %arg8[%c0_72, %c0_73] : memref<48x16xbf16, #tpu.memory_space<vmem>>, vector<48x16xbf16>
    %cst_74 = arith.constant dense<0.000000e+00> : vector<10x16xf32>
    %84 = tpu.matmul %82, %83, %cst_74 {dimension_numbers = #tpu.dot_dimension_numbers<[1], [0], [0], [1], [0, 0, 1, 1], [], []>} : vector<10x48xbf16>, vector<48x16xbf16>, vector<10x16xf32> -> vector<10x16xf32>
    %c0_75 = arith.constant 0 : index
    %c0_76 = arith.constant 0 : index
    %85 = vector.load %arg9[%c0_75, %c0_76] : memref<1x16xf32, #tpu.memory_space<vmem>>, vector<1x16xf32>
    %86 = vector.broadcast %85 : vector<1x16xf32> to vector<10x16xf32>
    %87 = arith.addf %84, %86 : vector<10x16xf32>
    %cst_77 = arith.constant 0.000000e+00 : f32
    %88 = vector.broadcast %cst_77 : f32 to vector<10x16xf32>
    %89 = arith.maximumf %87, %88 : vector<10x16xf32>
    %90 = vector.extract_strided_slice %89 {offsets = [0, 0], sizes = [8, 16], strides = [1, 1]} : vector<10x16xf32> to vector<8x16xf32>
    %c0_78 = arith.constant 0 : index
    %c0_79 = arith.constant 0 : index
    %91 = vector.load %arg21[%c0_78, %c0_79] : memref<144x128xf32, #tpu.memory_space<vmem>>, vector<8x16xf32>
    tpu.vector_store %arg21[%c0_78, %c0_79], %90 {strides = array<i32>} : memref<144x128xf32, #tpu.memory_space<vmem>>, vector<8x16xf32>,
    %92 = vector.extract_strided_slice %89 {offsets = [1, 0], sizes = [8, 16], strides = [1, 1]} : vector<10x16xf32> to vector<8x16xf32>
    %c0_80 = arith.constant 0 : index
    %c16_81 = arith.constant 16 : index
    %93 = vector.load %arg21[%c0_80, %c16_81] : memref<144x128xf32, #tpu.memory_space<vmem>>, vector<8x16xf32>
    tpu.vector_store %arg21[%c0_80, %c16_81], %92 {strides = array<i32>} : memref<144x128xf32, #tpu.memory_space<vmem>>, vector<8x16xf32>,
    %94 = vector.extract_strided_slice %89 {offsets = [2, 0], sizes = [8, 16], strides = [1, 1]} : vector<10x16xf32> to vector<8x16xf32>
    %c0_82 = arith.constant 0 : index
    %c32_83 = arith.constant 32 : index
    %95 = vector.load %arg21[%c0_82, %c32_83] : memref<144x128xf32, #tpu.memory_space<vmem>>, vector<8x16xf32>
    tpu.vector_store %arg21[%c0_82, %c32_83], %94 {strides = array<i32>} : memref<144x128xf32, #tpu.memory_space<vmem>>, vector<8x16xf32>,
    %c0_84 = arith.constant 0 : index
    %c0_85 = arith.constant 0 : index
    %96 = vector.load %arg21[%c0_84, %c0_85] : memref<144x128xf32, #tpu.memory_space<vmem>>, vector<8x48xf32>
    %97 = arith.truncf %96 : vector<8x48xf32> to vector<8x48xbf16>
    %c0_86 = arith.constant 0 : index
    %c0_87 = arith.constant 0 : index
    %98 = vector.load %arg10[%c0_86, %c0_87] : memref<48x16xbf16, #tpu.memory_space<vmem>>, vector<48x16xbf16>
    %cst_88 = arith.constant dense<0.000000e+00> : vector<8x16xf32>
    %99 = tpu.matmul %97, %98, %cst_88 {dimension_numbers = #tpu.dot_dimension_numbers<[1], [0], [0], [1], [0, 0, 1, 1], [], []>} : vector<8x48xbf16>, vector<48x16xbf16>, vector<8x16xf32> -> vector<8x16xf32>
    %c0_89 = arith.constant 0 : index
    %c0_90 = arith.constant 0 : index
    %100 = vector.load %arg11[%c0_89, %c0_90] : memref<1x16xf32, #tpu.memory_space<vmem>>, vector<1x16xf32>
    %101 = vector.broadcast %100 : vector<1x16xf32> to vector<8x16xf32>
    %102 = arith.addf %99, %101 : vector<8x16xf32>
    %cst_91 = arith.constant 0.000000e+00 : f32
    %103 = vector.broadcast %cst_91 : f32 to vector<8x16xf32>
    %104 = arith.maximumf %102, %103 : vector<8x16xf32>
    %105 = vector.extract_strided_slice %104 {offsets = [0, 0], sizes = [6, 16], strides = [1, 1]} : vector<8x16xf32> to vector<6x16xf32>
    %c0_92 = arith.constant 0 : index
    %c0_93 = arith.constant 0 : index
    %106 = vector.load %arg21[%c0_92, %c0_93] : memref<144x128xf32, #tpu.memory_space<vmem>>, vector<6x16xf32>
    tpu.vector_store %arg21[%c0_92, %c0_93], %105 {strides = array<i32>} : memref<144x128xf32, #tpu.memory_space<vmem>>, vector<6x16xf32>,
    %107 = vector.extract_strided_slice %104 {offsets = [1, 0], sizes = [6, 16], strides = [1, 1]} : vector<8x16xf32> to vector<6x16xf32>
    %c0_94 = arith.constant 0 : index
    %c16_95 = arith.constant 16 : index
    %108 = vector.load %arg21[%c0_94, %c16_95] : memref<144x128xf32, #tpu.memory_space<vmem>>, vector<6x16xf32>
    tpu.vector_store %arg21[%c0_94, %c16_95], %107 {strides = array<i32>} : memref<144x128xf32, #tpu.memory_space<vmem>>, vector<6x16xf32>,
    %109 = vector.extract_strided_slice %104 {offsets = [2, 0], sizes = [6, 16], strides = [1, 1]} : vector<8x16xf32> to vector<6x16xf32>
    %c0_96 = arith.constant 0 : index
    %c32_97 = arith.constant 32 : index
    %110 = vector.load %arg21[%c0_96, %c32_97] : memref<144x128xf32, #tpu.memory_space<vmem>>, vector<6x16xf32>
    tpu.vector_store %arg21[%c0_96, %c32_97], %109 {strides = array<i32>} : memref<144x128xf32, #tpu.memory_space<vmem>>, vector<6x16xf32>,
    %c0_98 = arith.constant 0 : index
    %c0_99 = arith.constant 0 : index
    %111 = vector.load %arg21[%c0_98, %c0_99] : memref<144x128xf32, #tpu.memory_space<vmem>>, vector<6x48xf32>
    %112 = arith.truncf %111 : vector<6x48xf32> to vector<6x48xbf16>
    %c0_100 = arith.constant 0 : index
    %c0_101 = arith.constant 0 : index
    %113 = vector.load %arg12[%c0_100, %c0_101] : memref<48x16xbf16, #tpu.memory_space<vmem>>, vector<48x16xbf16>
    %cst_102 = arith.constant dense<0.000000e+00> : vector<6x16xf32>
    %114 = tpu.matmul %112, %113, %cst_102 {dimension_numbers = #tpu.dot_dimension_numbers<[1], [0], [0], [1], [0, 0, 1, 1], [], []>} : vector<6x48xbf16>, vector<48x16xbf16>, vector<6x16xf32> -> vector<6x16xf32>
    %c0_103 = arith.constant 0 : index
    %c0_104 = arith.constant 0 : index
    %115 = vector.load %arg13[%c0_103, %c0_104] : memref<1x16xf32, #tpu.memory_space<vmem>>, vector<1x16xf32>
    %116 = vector.broadcast %115 : vector<1x16xf32> to vector<6x16xf32>
    %117 = arith.addf %114, %116 : vector<6x16xf32>
    %cst_105 = arith.constant 0.000000e+00 : f32
    %118 = vector.broadcast %cst_105 : f32 to vector<6x16xf32>
    %119 = arith.maximumf %117, %118 : vector<6x16xf32>
    %c0_106 = arith.constant 0 : index
    %c0_107 = arith.constant 0 : index
    %120 = vector.load %arg22[%c0_106, %c0_107] : memref<144x16xf32, #tpu.memory_space<vmem>>, vector<6x16xf32>
    tpu.vector_store %arg22[%c0_106, %c0_107], %119 {strides = array<i32>} : memref<144x16xf32, #tpu.memory_space<vmem>>, vector<6x16xf32>,
    %c0_108 = arith.constant 0 : index
    %c0_109 = arith.constant 0 : index
    %121 = tpu.strided_load %arg22[%c0_108, %c0_109] {strides = array<i32: 3, 1>} : memref<144x16xf32, #tpu.memory_space<vmem>>, vector<2x16xf32>
    %c1_110 = arith.constant 1 : index
    %c0_111 = arith.constant 0 : index
    %122 = tpu.strided_load %arg22[%c1_110, %c0_111] {strides = array<i32: 3, 1>} : memref<144x16xf32, #tpu.memory_space<vmem>>, vector<2x16xf32>
    %c2_112 = arith.constant 2 : index
    %c0_113 = arith.constant 0 : index
    %123 = tpu.strided_load %arg22[%c2_112, %c0_113] {strides = array<i32: 3, 1>} : memref<144x16xf32, #tpu.memory_space<vmem>>, vector<2x16xf32>
    %124 = arith.maximumf %121, %122 : vector<2x16xf32>
    %125 = arith.maximumf %124, %123 : vector<2x16xf32>
    %cst_114 = arith.constant 0.000000e+00 : f32
    %126 = vector.broadcast %cst_114 : f32 to vector<1x32xf32>
    %127 = vector.extract_strided_slice %125 {offsets = [0, 0], sizes = [1, 16], strides = [1, 1]} : vector<2x16xf32> to vector<1x16xf32>
    %128 = arith.truncf %127 : vector<1x16xf32> to vector<1x16xbf16>
    %c0_115 = arith.constant 0 : index
    %c0_116 = arith.constant 0 : index
    %129 = vector.load %arg14[%c0_115, %c0_116] : memref<32x32xbf16, #tpu.memory_space<vmem>>, vector<16x32xbf16>
    %cst_117 = arith.constant dense<0.000000e+00> : vector<1x32xf32>
    %130 = tpu.matmul %128, %129, %cst_117 {dimension_numbers = #tpu.dot_dimension_numbers<[1], [0], [0], [1], [0, 0, 1, 1], [], []>} : vector<1x16xbf16>, vector<16x32xbf16>, vector<1x32xf32> -> vector<1x32xf32>
    %131 = arith.addf %126, %130 : vector<1x32xf32>
    %132 = vector.extract_strided_slice %125 {offsets = [1, 0], sizes = [1, 16], strides = [1, 1]} : vector<2x16xf32> to vector<1x16xf32>
    %133 = arith.truncf %132 : vector<1x16xf32> to vector<1x16xbf16>
    %c16_118 = arith.constant 16 : index
    %c0_119 = arith.constant 0 : index
    %134 = vector.load %arg14[%c16_118, %c0_119] : memref<32x32xbf16, #tpu.memory_space<vmem>>, vector<16x32xbf16>
    %cst_120 = arith.constant dense<0.000000e+00> : vector<1x32xf32>
    %135 = tpu.matmul %133, %134, %cst_120 {dimension_numbers = #tpu.dot_dimension_numbers<[1], [0], [0], [1], [0, 0, 1, 1], [], []>} : vector<1x16xbf16>, vector<16x32xbf16>, vector<1x32xf32> -> vector<1x32xf32>
    %136 = arith.addf %131, %135 : vector<1x32xf32>
    %c0_121 = arith.constant 0 : index
    %c0_122 = arith.constant 0 : index
    %137 = vector.load %arg15[%c0_121, %c0_122] : memref<1x32xf32, #tpu.memory_space<vmem>>, vector<1x32xf32>
    %138 = arith.addf %136, %137 : vector<1x32xf32>
    %cst_123 = arith.constant 0.000000e+00 : f32
    %139 = vector.broadcast %cst_123 : f32 to vector<1x32xf32>
    %140 = arith.maximumf %138, %139 : vector<1x32xf32>
    %141 = arith.truncf %140 : vector<1x32xf32> to vector<1x32xbf16>
    %c0_124 = arith.constant 0 : index
    %c0_125 = arith.constant 0 : index
    %142 = vector.load %arg16[%c0_124, %c0_125] : memref<32x32xbf16, #tpu.memory_space<vmem>>, vector<32x32xbf16>
    %cst_126 = arith.constant dense<0.000000e+00> : vector<1x32xf32>
    %143 = tpu.matmul %141, %142, %cst_126 {dimension_numbers = #tpu.dot_dimension_numbers<[1], [0], [0], [1], [0, 0, 1, 1], [], []>} : vector<1x32xbf16>, vector<32x32xbf16>, vector<1x32xf32> -> vector<1x32xf32>
    %c0_127 = arith.constant 0 : index
    %c0_128 = arith.constant 0 : index
    %144 = vector.load %arg17[%c0_127, %c0_128] : memref<1x32xf32, #tpu.memory_space<vmem>>, vector<1x32xf32>
    %145 = arith.addf %143, %144 : vector<1x32xf32>
    %cst_129 = arith.constant 0.000000e+00 : f32
    %146 = vector.broadcast %cst_129 : f32 to vector<1x32xf32>
    %147 = arith.maximumf %145, %146 : vector<1x32xf32>
    %148 = arith.truncf %147 : vector<1x32xf32> to vector<1x32xbf16>
    %c0_130 = arith.constant 0 : index
    %c0_131 = arith.constant 0 : index
    %149 = vector.load %arg18[%c0_130, %c0_131] : memref<32x4xbf16, #tpu.memory_space<vmem>>, vector<32x4xbf16>
    %cst_132 = arith.constant dense<0.000000e+00> : vector<1x4xf32>
    %150 = tpu.matmul %148, %149, %cst_132 {dimension_numbers = #tpu.dot_dimension_numbers<[1], [0], [0], [1], [0, 0, 1, 1], [], []>} : vector<1x32xbf16>, vector<32x4xbf16>, vector<1x4xf32> -> vector<1x4xf32>
    %c0_133 = arith.constant 0 : index
    %c0_134 = arith.constant 0 : index
    %151 = vector.load %arg19[%c0_133, %c0_134] : memref<1x4xf32, #tpu.memory_space<vmem>>, vector<1x4xf32>
    %152 = arith.addf %150, %151 : vector<1x4xf32>
    %cst_135 = arith.constant dense<0xFF800000> : vector<1xf32>
    %153 = vector.multi_reduction <maximumf>, %152, %cst_135 [1] : vector<1x4xf32> to vector<1xf32>
    %154 = vector.shape_cast %153 : vector<1xf32> to vector<1x1xf32>
    %155 = vector.broadcast %154 : vector<1x1xf32> to vector<1x4xf32>
    %156 = arith.subf %152, %155 : vector<1x4xf32>
    %157 = math.exp %156 : vector<1x4xf32>
    %cst_136 = arith.constant dense<0.000000e+00> : vector<1xf32>
    %158 = vector.multi_reduction <add>, %157, %cst_136 [1] : vector<1x4xf32> to vector<1xf32>
    %159 = vector.shape_cast %158 : vector<1xf32> to vector<1x1xf32>
    %160 = vector.broadcast %159 : vector<1x1xf32> to vector<1x4xf32>
    %161 = arith.divf %157, %160 : vector<1x4xf32>
    %c0_137 = arith.constant 0 : index
    %c0_138 = arith.constant 0 : index
    %c0_139 = arith.constant 0 : index
    %162 = vector.load %arg20[%c0_137, %c0_138, %c0_139] : memref<1x1x4xf32, #tpu.memory_space<vmem>>, vector<1x1x4xf32>
    %163 = vector.shape_cast %162 : vector<1x1x4xf32> to vector<1x4xf32>
    %164 = vector.shape_cast %161 : vector<1x4xf32> to vector<1x1x4xf32>
    tpu.vector_store %arg20[%c0_137, %c0_138, %c0_139], %164 {strides = array<i32>} : memref<1x1x4xf32, #tpu.memory_space<vmem>>, vector<1x1x4xf32>,
    return
  }
  func.func @transform_0(%arg0: i32) -> (i32, i32, i32) {
    %c0_i32 = arith.constant 0 : i32
    %c0_i32_0 = arith.constant 0 : i32
    %c0_i32_1 = arith.constant 0 : i32
    return %arg0, %c0_i32, %c0_i32_0 : i32, i32, i32
  }
  func.func @transform_1(%arg0: i32) -> (i32, i32) {
    %c0_i32 = arith.constant 0 : i32
    %c0_i32_0 = arith.constant 0 : i32
    %c0_i32_1 = arith.constant 0 : i32
    return %c0_i32, %c0_i32_0 : i32, i32
  }
  func.func @transform_2(%arg0: i32) -> (i32, i32) {
    %c0_i32 = arith.constant 0 : i32
    %c0_i32_0 = arith.constant 0 : i32
    %c0_i32_1 = arith.constant 0 : i32
    return %c0_i32, %c0_i32_0 : i32, i32
  }
  func.func @transform_3(%arg0: i32) -> (i32, i32) {
    %c0_i32 = arith.constant 0 : i32
    %c0_i32_0 = arith.constant 0 : i32
    %c0_i32_1 = arith.constant 0 : i32
    return %c0_i32, %c0_i32_0 : i32, i32
  }
  func.func @transform_4(%arg0: i32) -> (i32, i32) {
    %c0_i32 = arith.constant 0 : i32
    %c0_i32_0 = arith.constant 0 : i32
    %c0_i32_1 = arith.constant 0 : i32
    return %c0_i32, %c0_i32_0 : i32, i32
  }
  func.func @transform_5(%arg0: i32) -> (i32, i32) {
    %c0_i32 = arith.constant 0 : i32
    %c0_i32_0 = arith.constant 0 : i32
    %c0_i32_1 = arith.constant 0 : i32
    return %c0_i32, %c0_i32_0 : i32, i32
  }
  func.func @transform_6(%arg0: i32) -> (i32, i32) {
    %c0_i32 = arith.constant 0 : i32
    %c0_i32_0 = arith.constant 0 : i32
    %c0_i32_1 = arith.constant 0 : i32
    return %c0_i32, %c0_i32_0 : i32, i32
  }
  func.func @transform_7(%arg0: i32) -> (i32, i32) {
    %c0_i32 = arith.constant 0 : i32
    %c0_i32_0 = arith.constant 0 : i32
    %c0_i32_1 = arith.constant 0 : i32
    return %c0_i32, %c0_i32_0 : i32, i32
  }
  func.func @transform_8(%arg0: i32) -> (i32, i32) {
    %c0_i32 = arith.constant 0 : i32
    %c0_i32_0 = arith.constant 0 : i32
    %c0_i32_1 = arith.constant 0 : i32
    return %c0_i32, %c0_i32_0 : i32, i32
  }
  func.func @transform_9(%arg0: i32) -> (i32, i32) {
    %c0_i32 = arith.constant 0 : i32
    %c0_i32_0 = arith.constant 0 : i32
    %c0_i32_1 = arith.constant 0 : i32
    return %c0_i32, %c0_i32_0 : i32, i32
  }
  func.func @transform_10(%arg0: i32) -> (i32, i32) {
    %c0_i32 = arith.constant 0 : i32
    %c0_i32_0 = arith.constant 0 : i32
    %c0_i32_1 = arith.constant 0 : i32
    return %c0_i32, %c0_i32_0 : i32, i32
  }
  func.func @transform_11(%arg0: i32) -> (i32, i32) {
    %c0_i32 = arith.constant 0 : i32
    %c0_i32_0 = arith.constant 0 : i32
    %c0_i32_1 = arith.constant 0 : i32
    return %c0_i32, %c0_i32_0 : i32, i32
  }
  func.func @transform_12(%arg0: i32) -> (i32, i32) {
    %c0_i32 = arith.constant 0 : i32
    %c0_i32_0 = arith.constant 0 : i32
    %c0_i32_1 = arith.constant 0 : i32
    return %c0_i32, %c0_i32_0 : i32, i32
  }
  func.func @transform_13(%arg0: i32) -> (i32, i32) {
    %c0_i32 = arith.constant 0 : i32
    %c0_i32_0 = arith.constant 0 : i32
    %c0_i32_1 = arith.constant 0 : i32
    return %c0_i32, %c0_i32_0 : i32, i32
  }
  func.func @transform_14(%arg0: i32) -> (i32, i32) {
    %c0_i32 = arith.constant 0 : i32
    %c0_i32_0 = arith.constant 0 : i32
    %c0_i32_1 = arith.constant 0 : i32
    return %c0_i32, %c0_i32_0 : i32, i32
  }
  func.func @transform_15(%arg0: i32) -> (i32, i32) {
    %c0_i32 = arith.constant 0 : i32
    %c0_i32_0 = arith.constant 0 : i32
    %c0_i32_1 = arith.constant 0 : i32
    return %c0_i32, %c0_i32_0 : i32, i32
  }
  func.func @transform_16(%arg0: i32) -> (i32, i32) {
    %c0_i32 = arith.constant 0 : i32
    %c0_i32_0 = arith.constant 0 : i32
    %c0_i32_1 = arith.constant 0 : i32
    return %c0_i32, %c0_i32_0 : i32, i32
  }
  func.func @transform_17(%arg0: i32) -> (i32, i32) {
    %c0_i32 = arith.constant 0 : i32
    %c0_i32_0 = arith.constant 0 : i32
    %c0_i32_1 = arith.constant 0 : i32
    return %c0_i32, %c0_i32_0 : i32, i32
  }
  func.func @transform_18(%arg0: i32) -> (i32, i32) {
    %c0_i32 = arith.constant 0 : i32
    %c0_i32_0 = arith.constant 0 : i32
    %c0_i32_1 = arith.constant 0 : i32
    return %c0_i32, %c0_i32_0 : i32, i32
  }
  func.func @transform_19(%arg0: i32) -> (i32, i32, i32) {
    %c0_i32 = arith.constant 0 : i32
    %c0_i32_0 = arith.constant 0 : i32
    %c0_i32_1 = arith.constant 0 : i32
    return %arg0, %c0_i32, %c0_i32_0 : i32, i32, i32
  }
}

</mosaic_0001>

<bundles_post_ra>
// kernel: tpu_custom_call.1
= control target key start
LH: loop header
LB: loop body
LE: loop exit
PB: predicated region body
PF: predicated region fallthrough
CT: control target
= control target key end

     0   :  { %s3820_s0 = inlined_call_operand.vmem [shape: f32[2,150,8], index: 0, kind: input, shape index: {}]   ;;  %s3821_s1 = inlined_call_operand.vmem [shape: bf16[56,16], index: 1, kind: input, shape index: {}]   ;;  %s3822_s2 = inlined_call_operand.vmem [shape: f32[1,16], index: 2, kind: input, shape index: {}]   ;;  %s3823_s3 = inlined_call_operand.vmem [shape: bf16[112,16], index: 3, kind: input, shape index: {}]   ;;  %s3824_s4 = inlined_call_operand.vmem [shape: f32[1,16], index: 4, kind: input, shape index: {}]   ;;  %s3825_s5 = inlined_call_operand.vmem [shape: bf16[48,16], index: 5, kind: input, shape index: {}]   ;;  %s3826_s6 = inlined_call_operand.vmem [shape: f32[1,16], index: 6, kind: input, shape index: {}]   ;;  %s3827_s7 = inlined_call_operand.vmem [shape: bf16[48,16], index: 7, kind: input, shape index: {}]   ;;  %s3828_s8 = inlined_call_operand.vmem [shape: f32[1,16], index: 8, kind: input, shape index: {}]   ;;  %s3829_s9 = inlined_call_operand.vmem [shape: bf16[48,16], index: 9, kind: input, shape index: {}]   ;;  %s3830_s10 = inlined_call_operand.vmem [shape: f32[1,16], index: 10, kind: input, shape index: {}]   ;;  %s3831_s11 = inlined_call_operand.vmem [shape: bf16[48,16], index: 11, kind: input, shape index: {}]   ;;  %s3832_s12 = inlined_call_operand.vmem [shape: f32[1,16], index: 12, kind: input, shape index: {}]   ;;  %s3833_s13 = inlined_call_operand.vmem [shape: bf16[32,32], index: 13, kind: input, shape index: {}]   ;;  %s3834_s14 = inlined_call_operand.vmem [shape: f32[1,32], index: 14, kind: input, shape index: {}]   ;;  %s3835_s15 = inlined_call_operand.vmem [shape: bf16[32,32], index: 15, kind: input, shape index: {}]   ;;  %s3836_s16 = inlined_call_operand.vmem [shape: f32[1,32], index: 16, kind: input, shape index: {}]   ;;  %s3837_s17 = inlined_call_operand.vmem [shape: bf16[32,4], index: 17, kind: input, shape index: {}]   ;;  %s3838_s18 = inlined_call_operand.vmem [shape: f32[1,4], index: 18, kind: input, shape index: {}]   ;;  %s3839_s19 = inlined_call_operand.hbm [shape: f32[2,1,4], index: 19, kind: output, shape index: {}]  }
   0x1   :  { %3862 = sst [smem:[#allocation10_spill]] %s3820_s0 }
   0x2   :  { %3863 = sst [smem:[#allocation11_spill]] %s3821_s1 }
   0x3   :  { %3864 = sst [smem:[#allocation12_spill]] %s3822_s2 }
   0x4   :  { %3865 = sst [smem:[#allocation13_spill]] %s3823_s3 }
   0x5   :  { %3866 = sst [smem:[#allocation14_spill]] %s3824_s4 }
   0x6   :  { %3867 = sst [smem:[#allocation15_spill]] %s3825_s5 }
   0x7   :  { %3868 = sst [smem:[#allocation16_spill]] %s3826_s6 }
   0x8   :  { %3869 = sst [smem:[#allocation17_spill]] %s3827_s7 }
   0x9   :  { %24 = vsyncpa [#allocation5], 0 }
   0xa   :  { %26 = vsyncpa [#allocation5 + $0x1], 0  ;;  %s2968_s0 = smov 0   ;;  %s2970_s30 = smov 0  }
   0xb   :  { %s2972_s20 = smov 0   ;;  %s2974_s21 = smov 0  }
   0xc LB: > { %3870 = sst [smem:[#allocation7_spill]] %s2850_s20  ;;  %s2989_s1 = sadd.s32 4294967295, %s2854_s21   ;;  %s2854_s21 = sphi %s2974_s21, %s3891_s21   ;;  %s2850_s20 = sphi %s2972_s20, %s3893_s20   ;;  %s2846_s30 = sphi %s2970_s30, %s3895_s30   ;;  %s2842_s0 = sphi %s2968_s0, %s3894_s0  }
   0xd   : > { %s2460_s22 = sadd.s32 4294967294, %s2854_s21   ;;  %s2993_s2 = sadd.s32 1, %s2854_s21  }
   0xe   : > { %3871 = sst [smem:[#allocation8_spill]] %s2993_s2  ;;  %s443_s23 = sadd.s32 1, %s2850_s20 }
   0xf   : > { %s440_s24 = ssub.s32 %s2854_s21, %s2993_s2  ;;  %p453_p0 = scmp.ne.s32.totalorder %s2850_s20, %s2846_s30 }
  0x10   : > { %p441_p1 = scmp.eq.s32.totalorder %s440_s24, 0  ;;  %p454_p2 = scmp.eq.s32.totalorder %s2989_s1, 1 }
  0x11   : > { %p459_p3 = scmp.ne.s32.totalorder %s2846_s30, %s2842_s0  ;;  %p460_p4 = scmp.eq.s32.totalorder %s2460_s22, 1 }
  0x12   : > { %s3004_s25 = scalar_select %p441_p1, %s2850_s20, %s443_s23  }
  0x13   : > { %p3006_p5 = por %p454_p2, %p453_p0  ;;  %p3010_p6 = por %p460_p4, %p459_p3 }
  0x14   : > { %3872 = sst [smem:[#allocation9_spill]] %s3004_s25  ;;  %p2463_p7 = scmp.ge.s32.totalorder %s2854_s21, 1 }
  0x15   : > { %p540_p8 = scmp.lt.s32.totalorder %s2854_s21, 3 }
  0x17   : > { %p541_p9 = pnand %p2463_p7, %p540_p8 }
  0x18   : > { %p595_p10 = scmp.lt.s32.totalorder (!%p541_p9), %s2989_s1, 1  ;;  %s3875_s23 = sld [smem:[#allocation10_spill]] (!%p541_p9) }
  0x19   : > { %544 = sbr.rel (%p541_p9) target bundleno = 3199 (0xc7f), region = 96  ;;  %s3847_s25 = smov (!%p541_p9), 24  }
  0x1a   : > { %s3853_s20 = smov (!%p541_p9), 48   ;;  %s3878_s29 = smov (!%p541_p9), 16  }
  0x1b   : > { %s3879_s22 = smov (!%p541_p9), 24   ;;  %s3882_s2 = smov (!%p541_p9), 32  }
  0x1c   : > { %s3887_s4 = sld [smem:[#allocation14_spill]] (!%p541_p9) }
  0x1d   : > { %s3888_s5 = sld [smem:[#allocation15_spill]] (!%p541_p9) }
  0x1e   : > { %s596_s27 = scalar_select %p595_p10, %s2989_s1, 1  ;;  %vm620_vm0 = vcmask 64512   ;;  %vm1222_vm1 = vcmask 1043456   ;;  %v2859_v14 = vmov 0.0   ;;  %vm2863_vm2 = vmmov 0  }
  0x1f   : > { %2572 = vmatprep.subr.bf16.mxu0 %v2859_v14  ;;  %2616 = vmatprep.subr.bf16.mxu1 %v2859_v14  ;;  %vm717_vm3 = vcmask 130112   ;;  %vm715_vm4 = vcmask 130113   ;;  %vm794_vm5 = vcmask 195714   ;;  %vm796_vm6 = vcmask 195712   ;;  %s3889_s7 = sld [smem:[#allocation17_spill]] }
  0x20   : > { %s2710_s28 = smul.u32 152, %s596_s27  ;;  %s3844_s27 = smov 8   ;;  %2580 = vmatprep.mubr.msk.bf16.mxu0 %vm2863_vm2, %v2859_v14  ;;  %2630 = vmatprep.mubr.msk.bf16.mxu1 %vm2863_vm2, %v2859_v14  ;;  %vm875_vm7 = vcmask 261312   ;;  %vm873_vm8 = vcmask 261315   ;;  %vm952_vm9 = vcmask 326916   ;;  %vm954_vm10 = vcmask 326912  }
  0x21   : > { %vm1033_vm11 = vcmask 392512   ;;  %vm1031_vm12 = vcmask 392517   ;;  %vm1110_vm13 = vcmask 458118   ;;  %vm1112_vm14 = vcmask 458112   ;;  %s3890_s6 = sld [smem:[#allocation16_spill]] }
  0x22   : > { %s3021_s24 = scalar_lea.vmem %s3875_s23, %s2710_s28  ;;  %s3842_s28 = smov 16   ;;  %vm1194_vm15 = vcmask 457728  }
  0x23   : > { %v3024_v0 = vld [vmem:[%s3021_s24 + $0x10] sm:$0xff]  ;;  %v3027_v1 = vld [vmem:[%s3021_s24] sm:$0xff]  ;;  %v3030_v2 = vld [vmem:[%s3021_s24 + $0x8] sm:$0xff]  ;;  %s3876_s23 = sld [smem:[#allocation11_spill]] }
  0x24   : > { %662 = vrot.lane.b32.xlu1 %v3024_v0, %s3844_s27  ;;  %658 = vrot.lane.b32.xlu0 %v3027_v1, %s3844_s27  ;;  %v3037_v3 = vld [vmem:[%s3021_s24 + $0x20] sm:$0xff]  ;;  %v3040_v4 = vld [vmem:[%s3021_s24 + $0x18] sm:$0xff]  ;;  %622 = vst.msk [vmem:[#allocation2 + $0x8] sm:$0xff] %vm620_vm0, %v3030_v2  ;;  %623 = vst.msk [vmem:[#allocation2 + $0x10] sm:$0xff] %vm620_vm0, %v3024_v0 }
  0x25   : > { %621 = vst.msk [vmem:[#allocation2] sm:$0xff] %vm620_vm0, %v3027_v1  ;;  %v3049_v5 = vld [vmem:[%s3021_s24 + $0x30] sm:$0xff]  ;;  %v3052_v6 = vld [vmem:[%s3021_s24 + $0x28] sm:$0xff]  ;;  %v3055_v7 = vld [vmem:[%s3021_s24 + $0x40] sm:$0xff] }
  0x26   : > { %624 = vst.msk [vmem:[#allocation2 + $0x18] sm:$0xff] %vm620_vm0, %v3040_v4  ;;  %625 = vst.msk [vmem:[#allocation2 + $0x20] sm:$0xff] %vm620_vm0, %v3037_v3  ;;  %v3062_v8 = vld [vmem:[%s3021_s24 + $0x38] sm:$0xff]  ;;  %v3065_v9 = vld [vmem:[%s3021_s24 + $0x50] sm:$0xff] }
  0x27   : > { %v3068_v10 = vld [vmem:[%s3021_s24 + $0x48] sm:$0xff]  ;;  %626 = vst.msk [vmem:[#allocation2 + $0x28] sm:$0xff] %vm620_vm0, %v3052_v6  ;;  %627 = vst.msk [vmem:[#allocation2 + $0x30] sm:$0xff] %vm620_vm0, %v3049_v5  ;;  %v3083_v11 = vld [vmem:[%s3021_s24 + $0x60] sm:$0xff] }
  0x28   : > { %629 = vst.msk [vmem:[#allocation2 + $0x40] sm:$0xff] %vm620_vm0, %v3055_v7  ;;  %628 = vst.msk [vmem:[#allocation2 + $0x38] sm:$0xff] %vm620_vm0, %v3062_v8  ;;  %v3086_v12 = vld [vmem:[%s3021_s24 + $0x58] sm:$0xff]  ;;  %737 = vrot.lane.b32.xlu1 %v3027_v1, %s3842_s28  ;;  %660 = vrot.lane.b32.xlu0 %v3030_v2, %s3844_s27  ;;  %v3134_v19 = vld [vmem:[%s3021_s24 + $0x70] sm:$0xff]  ;;  %s3877_s27 = smov 8  }
  0x29   : > { %630 = vst.msk [vmem:[#allocation2 + $0x48] sm:$0xff] %vm620_vm0, %v3068_v10  ;;  %631 = vst.msk [vmem:[#allocation2 + $0x50] sm:$0xff] %vm620_vm0, %v3065_v9  ;;  %v2761_v13 = vld [vmem:[%s3876_s23 + $0x18] ss:$0 sps:$4 sm:$0xff]   ;;  %v2762_v16 = vld [vmem:[%s3876_s23 + $0x10] sm:$0xff]  }
  0x2a   : > { %633 = vst.msk [vmem:[#allocation2 + $0x60] sm:$0xff] %vm620_vm0, %v3083_v11  ;;  %632 = vst.msk [vmem:[#allocation2 + $0x58] sm:$0xff] %vm620_vm0, %v3086_v12  ;;  %v1224_v15 = vsel %vm1222_vm1, %v2761_v13, 0  ;;  %v2763_v17 = vld [vmem:[%s3876_s23 + $0x8] sm:$0xff]   ;;  %v2764_v18 = vld [vmem:[%s3876_s23] sm:$0xff]   ;;  %vm814_vm1 = vcmask 189568  }
  0x2b   : > { %2573 = vmatpush3.bf16.msra.mxu0 %v1224_v15  ;;  %v3137_v20 = vld [vmem:[%s3021_s24 + $0x68] sm:$0xff]  ;;  %635 = vst.msk [vmem:[#allocation2 + $0x70] sm:$0xff] %vm620_vm0, %v3134_v19  ;;  %v3173_v21 = vld [vmem:[%s3021_s24 + $0x80] sm:$0xff]  ;;  %v3176_v22 = vld [vmem:[%s3021_s24 + $0x78] sm:$0xff]  ;;  %s2867_s23 = smov [#allocation4]  }
  0x2c   : > { %741 = vrot.lane.b32.xlu1 %v3024_v0, %s3842_s28  ;;  %739 = vrot.lane.b32.xlu0 %v3030_v2, %s3842_s28  ;;  %s3849_s28 = smov 32   ;;  %634 = vst.msk [vmem:[#allocation2 + $0x68] sm:$0xff] %vm620_vm0, %v3137_v20  ;;  %637 = vst.msk [vmem:[#allocation2 + $0x80] sm:$0xff] %vm620_vm0, %v3173_v21  ;;  %v3207_v23 = vld [vmem:[%s3021_s24 + $0x88] sm:$0xff] }
  0x2d   : > { %2574 = vmatprep.subr.bf16.mxu0 %v2859_v14  ;;  %636 = vst.msk [vmem:[#allocation2 + $0x78] sm:$0xff] %vm620_vm0, %v3176_v22  ;;  %638 = vst.msk [vmem:[#allocation2 + $0x88] sm:$0xff] %vm620_vm0, %v3207_v23  ;;  %vm735_vm0 = vcmask 122944  }
  0x2f   : > { %2575 = vmatpush3.bf16.msra.mxu0 %v2762_v16 }
  0x30   : > { %818 = vrot.lane.b32.xlu1 %v3030_v2, %s3847_s25  ;;  %816 = vrot.lane.b32.xlu0 %v3027_v1, %s3847_s25 }
  0x31   : > { %2576 = vmatprep.subr.bf16.mxu0 %v2859_v14 }
  0x33   : > { %2577 = vmatpush3.bf16.msra.mxu0 %v2763_v17 }
  0x34   : > { %895 = vrot.lane.b32.xlu1 %v3027_v1, %s3849_s28  ;;  %820 = vrot.lane.b32.xlu0 %v3024_v0, %s3847_s25  ;;  %s2861_s25 = smov 40  }
  0x35   : > { %2578 = vmatprep.subr.bf16.mxu0 %v2859_v14 }
  0x37   : > { %2579 = vmatpush3.bf16.msra.mxu0 %v2764_v18 }
  0x38   : > { %899 = vrot.lane.b32.xlu1 %v3024_v0, %s3849_s28  ;;  %897 = vrot.lane.b32.xlu0 %v3030_v2, %s3849_s28 }
  0x39   : > { %2672 = vmatprep.subr.bf16.mxu0 %v2859_v14 }
  0x3c   : > { %976 = vrot.lane.b32.xlu1 %v3030_v2, %s2861_s25  ;;  %974 = vrot.lane.b32.xlu0 %v3027_v1, %s2861_s25 }
  0x40   : > { %1053 = vrot.lane.b32.xlu1 %v3027_v1, %s3853_s20  ;;  %978 = vrot.lane.b32.xlu0 %v3024_v0, %s2861_s25 }
  0x44   : > { %1057 = vrot.lane.b32.xlu1 %v3024_v0, %s3853_s20  ;;  %1055 = vrot.lane.b32.xlu0 %v3030_v2, %s3853_s20 }
  0x48   : > { %666 = vrot.lane.b32.xlu1 %v3037_v3, %s3877_s27  ;;  %664 = vrot.lane.b32.xlu0 %v3040_v4, %s3877_s27 }
  0x4c   : > { %745 = vrot.lane.b32.xlu1 %v3037_v3, %s3878_s29  ;;  %743 = vrot.lane.b32.xlu0 %v3040_v4, %s3878_s29 }
  0x50   : > { %824 = vrot.lane.b32.xlu1 %v3037_v3, %s3879_s22  ;;  %822 = vrot.lane.b32.xlu0 %v3040_v4, %s3879_s22 }
  0x54   : > { %903 = vrot.lane.b32.xlu1 %v3037_v3, %s3849_s28  ;;  %901 = vrot.lane.b32.xlu0 %v3040_v4, %s3849_s28 }
  0x58   : > { %982 = vrot.lane.b32.xlu1 %v3037_v3, %s2861_s25  ;;  %980 = vrot.lane.b32.xlu0 %v3040_v4, %s2861_s25 }
  0x5c   : > { %1061 = vrot.lane.b32.xlu1 %v3037_v3, %s3853_s20  ;;  %1059 = vrot.lane.b32.xlu0 %v3040_v4, %s3853_s20 }
  0x60   : > { %670 = vrot.lane.b32.xlu1 %v3049_v5, %s3877_s27  ;;  %668 = vrot.lane.b32.xlu0 %v3052_v6, %s3877_s27 }
  0x64   : > { %749 = vrot.lane.b32.xlu1 %v3049_v5, %s3878_s29  ;;  %747 = vrot.lane.b32.xlu0 %v3052_v6, %s3878_s29 }
  0x68   : > { %828 = vrot.lane.b32.xlu1 %v3049_v5, %s3879_s22  ;;  %826 = vrot.lane.b32.xlu0 %v3052_v6, %s3879_s22 }
  0x6c   : > { %907 = vrot.lane.b32.xlu1 %v3049_v5, %s3849_s28  ;;  %905 = vrot.lane.b32.xlu0 %v3052_v6, %s3849_s28 }
  0x70   : > { %986 = vrot.lane.b32.xlu1 %v3049_v5, %s2861_s25  ;;  %984 = vrot.lane.b32.xlu0 %v3052_v6, %s2861_s25 }
  0x74   : > { %1065 = vrot.lane.b32.xlu1 %v3049_v5, %s3853_s20  ;;  %1063 = vrot.lane.b32.xlu0 %v3052_v6, %s3853_s20 }
  0x78   : > { %674 = vrot.lane.b32.xlu1 %v3055_v7, %s3877_s27  ;;  %672 = vrot.lane.b32.xlu0 %v3062_v8, %s3877_s27 }
  0x7c   : > { %753 = vrot.lane.b32.xlu1 %v3055_v7, %s3878_s29  ;;  %751 = vrot.lane.b32.xlu0 %v3062_v8, %s3878_s29 }
  0x80   : > { %832 = vrot.lane.b32.xlu1 %v3055_v7, %s3879_s22  ;;  %830 = vrot.lane.b32.xlu0 %v3062_v8, %s3879_s22 }
  0x84   : > { %911 = vrot.lane.b32.xlu1 %v3055_v7, %s3849_s28  ;;  %909 = vrot.lane.b32.xlu0 %v3062_v8, %s3849_s28 }
  0x88   : > { %990 = vrot.lane.b32.xlu1 %v3055_v7, %s2861_s25  ;;  %988 = vrot.lane.b32.xlu0 %v3062_v8, %s2861_s25 }
  0x8c   : > { %1069 = vrot.lane.b32.xlu1 %v3055_v7, %s3853_s20  ;;  %1067 = vrot.lane.b32.xlu0 %v3062_v8, %s3853_s20 }
  0x90   : > { %678 = vrot.lane.b32.xlu1 %v3065_v9, %s3877_s27  ;;  %676 = vrot.lane.b32.xlu0 %v3068_v10, %s3877_s27 }
  0x94   : > { %757 = vrot.lane.b32.xlu1 %v3065_v9, %s3878_s29  ;;  %755 = vrot.lane.b32.xlu0 %v3068_v10, %s3878_s29 }
  0x96   : > { %v663_v24 = vpop.permute.xlu1 %662  ;;  %v659_v25 = vpop.permute.xlu0 %658 }
  0x97   : > { %719 = vst.msk [vmem:[#allocation2 + $0xf] sm:$0xff] %vm717_vm3, %v663_v24 }
  0x98   : > { %716 = vst.msk [vmem:[#allocation2 - $0x1] sm:$0xfe] %vm715_vm4, %v659_v25  ;;  %836 = vrot.lane.b32.xlu1 %v3065_v9, %s3879_s22  ;;  %834 = vrot.lane.b32.xlu0 %v3068_v10, %s3879_s22  ;;  %vm893_vm4 = vcmask 256192  }
  0x9a   : > { %v738_v26 = vpop.permute.xlu1 %737  ;;  %v661_v27 = vpop.permute.xlu0 %660 }
  0x9b   : > { %795 = vst.msk [vmem:[#allocation2 - $0x2] sm:$0xfc] %vm794_vm5, %v738_v26  ;;  %vm1051_vm5 = vcmask 389440  }
  0x9c   : > { %718 = vst.msk [vmem:[#allocation2 + $0x7] sm:$0xff] %vm717_vm3, %v661_v27  ;;  %915 = vrot.lane.b32.xlu1 %v3065_v9, %s3849_s28  ;;  %913 = vrot.lane.b32.xlu0 %v3068_v10, %s3849_s28 }
  0x9e   : > { %v742_v28 = vpop.permute.xlu1 %741  ;;  %v740_v29 = vpop.permute.xlu0 %739 }
  0x9f   : > { %798 = vst.msk [vmem:[#allocation2 + $0xe] sm:$0xff] %vm796_vm6, %v742_v28  ;;  %797 = vst.msk [vmem:[#allocation2 + $0x6] sm:$0xff] %vm796_vm6, %v740_v29 }
  0xa0   : > { %994 = vrot.lane.b32.xlu1 %v3065_v9, %s2861_s25  ;;  %992 = vrot.lane.b32.xlu0 %v3068_v10, %s2861_s25 }
  0xa2   : > { %v819_v30 = vpop.permute.xlu1 %818  ;;  %v817_v31 = vpop.permute.xlu0 %816 }
  0xa3   : > { %876 = vst.msk [vmem:[#allocation2 + $0x5] sm:$0xff] %vm875_vm7, %v819_v30 }
  0xa4   : > { %874 = vst.msk [vmem:[#allocation2 - $0x3] sm:$0xf8] %vm873_vm8, %v817_v31  ;;  %1073 = vrot.lane.b32.xlu1 %v3065_v9, %s3853_s20  ;;  %1071 = vrot.lane.b32.xlu0 %v3068_v10, %s3853_s20  ;;  %v619_v10 = vld [vmem:[%s3021_s24 + $0x90] sm:$0x3f]  ;;  %s3856_s24 = smov 80   ;;  %vm1446_vm8 = vcmask 261249  }
  0xa6   : > { %v896_v32 = vpop.permute.xlu1 %895  ;;  %v821_v33 = vpop.permute.xlu0 %820 }
  0xa7   : > { %953 = vst.msk [vmem:[#allocation2 - $0x4] sm:$0xf0] %vm952_vm9, %v896_v32  ;;  %vm1473_vm9 = vcmask 392450  }
  0xa8   : > { %877 = vst.msk [vmem:[#allocation2 + $0xd] sm:$0xff] %vm875_vm7, %v821_v33  ;;  %682 = vrot.lane.b32.xlu1 %v3083_v11, %s3877_s27  ;;  %680 = vrot.lane.b32.xlu0 %v3086_v12, %s3877_s27 }
  0xaa   : > { %v900_v34 = vpop.permute.xlu1 %899  ;;  %v898_v35 = vpop.permute.xlu0 %897 }
  0xab   : > { %956 = vst.msk [vmem:[#allocation2 + $0xc] sm:$0xff] %vm954_vm10, %v900_v34  ;;  %955 = vst.msk [vmem:[#allocation2 + $0x4] sm:$0xff] %vm954_vm10, %v898_v35 }
  0xac   : > { %761 = vrot.lane.b32.xlu1 %v3083_v11, %s3878_s29  ;;  %759 = vrot.lane.b32.xlu0 %v3086_v12, %s3878_s29 }
  0xae   : > { %v977_v36 = vpop.permute.xlu1 %976  ;;  %v975_v37 = vpop.permute.xlu0 %974 }
  0xaf   : > { %1034 = vst.msk [vmem:[#allocation2 + $0x3] sm:$0xff] %vm1033_vm11, %v977_v36 }
  0xb0   : > { %1032 = vst.msk [vmem:[#allocation2 - $0x5] sm:$0xe0] %vm1031_vm12, %v975_v37  ;;  %840 = vrot.lane.b32.xlu1 %v3083_v11, %s3879_s22  ;;  %838 = vrot.lane.b32.xlu0 %v3086_v12, %s3879_s22  ;;  %vm1554_vm12 = vcmask 786053  }
  0xb2   : > { %v1054_v38 = vpop.permute.xlu1 %1053  ;;  %v979_v39 = vpop.permute.xlu0 %978 }
  0xb3   : > { %1111 = vst.msk [vmem:[#allocation2 - $0x6] sm:$0xc0] %vm1110_vm13, %v1054_v38  ;;  %vm1581_vm13 = vcmask 917254  }
  0xb4   : > { %1035 = vst.msk [vmem:[#allocation2 + $0xb] sm:$0xff] %vm1033_vm11, %v979_v39  ;;  %919 = vrot.lane.b32.xlu1 %v3083_v11, %s3849_s28  ;;  %917 = vrot.lane.b32.xlu0 %v3086_v12, %s3849_s28 }
  0xb6   : > { %v1058_v40 = vpop.permute.xlu1 %1057  ;;  %v1056_v41 = vpop.permute.xlu0 %1055 }
  0xb7   : > { %1114 = vst.msk [vmem:[#allocation2 + $0xa] sm:$0xff] %vm1112_vm14, %v1058_v40  ;;  %1113 = vst.msk [vmem:[#allocation2 + $0x2] sm:$0xff] %vm1112_vm14, %v1056_v41 }
  0xb8   : > { %998 = vrot.lane.b32.xlu1 %v3083_v11, %s2861_s25  ;;  %996 = vrot.lane.b32.xlu0 %v3086_v12, %s2861_s25 }
  0xba   : > { %v667_v42 = vpop.permute.xlu1 %666  ;;  %v665_v43 = vpop.permute.xlu0 %664 }
  0xbb   : > { %721 = vst.msk [vmem:[#allocation2 + $0x1f] sm:$0xff] %vm717_vm3, %v667_v42  ;;  %720 = vst.msk [vmem:[#allocation2 + $0x17] sm:$0xff] %vm717_vm3, %v665_v43 }
  0xbc   : > { %1077 = vrot.lane.b32.xlu1 %v3083_v11, %s3853_s20  ;;  %1075 = vrot.lane.b32.xlu0 %v3086_v12, %s3853_s20 }
  0xbe   : > { %v746_v44 = vpop.permute.xlu1 %745  ;;  %v744_v45 = vpop.permute.xlu0 %743  ;;  %v1132_v46 = vld [vmem:[#allocation2] sm:$0xff]  ;;  %v1133_v47 = vld [vmem:[#allocation2 + $0x8] sm:$0xff] }
  0xbf   : > { %800 = vst.msk [vmem:[#allocation2 + $0x1e] sm:$0xff] %vm796_vm6, %v746_v44  ;;  %799 = vst.msk [vmem:[#allocation2 + $0x16] sm:$0xff] %vm796_vm6, %v744_v45  ;;  %v1150_v48 = vpack.c.bf16 %v1133_v47, %v1132_v46 }
  0xc0   : > { %686 = vrot.lane.b32.xlu1 %v3134_v19, %s3877_s27  ;;  %684 = vrot.lane.b32.xlu0 %v3137_v20, %s3877_s27 }
  0xc1   : > { %2581 = vmatmul.mubr.msk.bf16.vlgmr.msra.gmra.mxu0 %vm1194_vm15, %v1150_v48 }
  0xc2   : > { %v825_v49 = vpop.permute.xlu1 %824  ;;  %v823_v50 = vpop.permute.xlu0 %822  ;;  %2584 = vmatprep.mubr.msk.bf16.mxu0 %vm2863_vm2, %v2859_v14 }
  0xc3   : > { %879 = vst.msk [vmem:[#allocation2 + $0x1d] sm:$0xff] %vm875_vm7, %v825_v49  ;;  %878 = vst.msk [vmem:[#allocation2 + $0x15] sm:$0xff] %vm875_vm7, %v823_v50 }
  0xc4   : > { %765 = vrot.lane.b32.xlu1 %v3134_v19, %s3878_s29  ;;  %763 = vrot.lane.b32.xlu0 %v3137_v20, %s3878_s29 }
  0xc6   : > { %v904_v51 = vpop.permute.xlu1 %903  ;;  %v902_v52 = vpop.permute.xlu0 %901 }
  0xc7   : > { %958 = vst.msk [vmem:[#allocation2 + $0x1c] sm:$0xff] %vm954_vm10, %v904_v51  ;;  %957 = vst.msk [vmem:[#allocation2 + $0x14] sm:$0xff] %vm954_vm10, %v902_v52 }
  0xc8   : > { %844 = vrot.lane.b32.xlu1 %v3134_v19, %s3879_s22  ;;  %842 = vrot.lane.b32.xlu0 %v3137_v20, %s3879_s22 }
  0xca   : > { %v983_v53 = vpop.permute.xlu1 %982  ;;  %v981_v54 = vpop.permute.xlu0 %980 }
  0xcb   : > { %1037 = vst.msk [vmem:[#allocation2 + $0x1b] sm:$0xff] %vm1033_vm11, %v983_v53  ;;  %1036 = vst.msk [vmem:[#allocation2 + $0x13] sm:$0xff] %vm1033_vm11, %v981_v54 }
  0xcc   : > { %923 = vrot.lane.b32.xlu1 %v3134_v19, %s3849_s28  ;;  %921 = vrot.lane.b32.xlu0 %v3137_v20, %s3849_s28 }
  0xce   : > { %v1062_v55 = vpop.permute.xlu1 %1061  ;;  %v1060_v56 = vpop.permute.xlu0 %1059 }
  0xcf   : > { %1116 = vst.msk [vmem:[#allocation2 + $0x1a] sm:$0xff] %vm1112_vm14, %v1062_v55  ;;  %1115 = vst.msk [vmem:[#allocation2 + $0x12] sm:$0xff] %vm1112_vm14, %v1060_v56 }
  0xd0   : > { %1002 = vrot.lane.b32.xlu1 %v3134_v19, %s2861_s25  ;;  %1000 = vrot.lane.b32.xlu0 %v3137_v20, %s2861_s25 }
  0xd2   : > { %v671_v57 = vpop.permute.xlu1 %670  ;;  %v669_v58 = vpop.permute.xlu0 %668 }
  0xd3   : > { %723 = vst.msk [vmem:[#allocation2 + $0x2f] sm:$0xff] %vm717_vm3, %v671_v57  ;;  %722 = vst.msk [vmem:[#allocation2 + $0x27] sm:$0xff] %vm717_vm3, %v669_v58 }
  0xd4   : > { %1081 = vrot.lane.b32.xlu1 %v3134_v19, %s3853_s20  ;;  %1079 = vrot.lane.b32.xlu0 %v3137_v20, %s3853_s20 }
  0xd6   : > { %v750_v59 = vpop.permute.xlu1 %749  ;;  %v748_v60 = vpop.permute.xlu0 %747  ;;  %v1134_v61 = vld [vmem:[#allocation2 + $0x10] sm:$0xff]  ;;  %v1135_v62 = vld [vmem:[#allocation2 + $0x18] sm:$0xff] }
  0xd7   : > { %802 = vst.msk [vmem:[#allocation2 + $0x2e] sm:$0xff] %vm796_vm6, %v750_v59  ;;  %801 = vst.msk [vmem:[#allocation2 + $0x26] sm:$0xff] %vm796_vm6, %v748_v60  ;;  %v1151_v63 = vpack.c.bf16 %v1135_v62, %v1134_v61 }
  0xd8   : > { %690 = vrot.lane.b32.xlu1 %v3173_v21, %s3877_s27  ;;  %688 = vrot.lane.b32.xlu0 %v3176_v22, %s3877_s27 }
  0xd9   : > { %2585 = vmatmul.mubr.msk.bf16.gmra.mxu0 %vm1194_vm15, %v1151_v63 }
  0xda   : > { %v829_v0 = vpop.permute.xlu1 %828  ;;  %v827_v1 = vpop.permute.xlu0 %826  ;;  %2588 = vmatprep.mubr.msk.bf16.mxu0 %vm2863_vm2, %v2859_v14 }
  0xdb   : > { %881 = vst.msk [vmem:[#allocation2 + $0x2d] sm:$0xff] %vm875_vm7, %v829_v0  ;;  %880 = vst.msk [vmem:[#allocation2 + $0x25] sm:$0xff] %vm875_vm7, %v827_v1 }
  0xdc   : > { %769 = vrot.lane.b32.xlu1 %v3173_v21, %s3878_s29  ;;  %767 = vrot.lane.b32.xlu0 %v3176_v22, %s3878_s29 }
  0xde   : > { %v908_v2 = vpop.permute.xlu1 %907  ;;  %v906_v3 = vpop.permute.xlu0 %905 }
  0xdf   : > { %960 = vst.msk [vmem:[#allocation2 + $0x2c] sm:$0xff] %vm954_vm10, %v908_v2  ;;  %959 = vst.msk [vmem:[#allocation2 + $0x24] sm:$0xff] %vm954_vm10, %v906_v3 }
  0xe0   : > { %848 = vrot.lane.b32.xlu1 %v3173_v21, %s3879_s22  ;;  %846 = vrot.lane.b32.xlu0 %v3176_v22, %s3879_s22 }
  0xe2   : > { %v987_v4 = vpop.permute.xlu1 %986  ;;  %v985_v5 = vpop.permute.xlu0 %984 }
  0xe3   : > { %1039 = vst.msk [vmem:[#allocation2 + $0x2b] sm:$0xff] %vm1033_vm11, %v987_v4  ;;  %1038 = vst.msk [vmem:[#allocation2 + $0x23] sm:$0xff] %vm1033_vm11, %v985_v5 }
  0xe4   : > { %927 = vrot.lane.b32.xlu1 %v3173_v21, %s3849_s28  ;;  %925 = vrot.lane.b32.xlu0 %v3176_v22, %s3849_s28 }
  0xe6   : > { %v1066_v6 = vpop.permute.xlu1 %1065  ;;  %v1064_v7 = vpop.permute.xlu0 %1063 }
  0xe7   : > { %1118 = vst.msk [vmem:[#allocation2 + $0x2a] sm:$0xff] %vm1112_vm14, %v1066_v6  ;;  %1117 = vst.msk [vmem:[#allocation2 + $0x22] sm:$0xff] %vm1112_vm14, %v1064_v7 }
  0xe8   : > { %1006 = vrot.lane.b32.xlu1 %v3173_v21, %s2861_s25  ;;  %1004 = vrot.lane.b32.xlu0 %v3176_v22, %s2861_s25 }
  0xea   : > { %v675_v8 = vpop.permute.xlu1 %674  ;;  %v673_v9 = vpop.permute.xlu0 %672 }
  0xeb   : > { %725 = vst.msk [vmem:[#allocation2 + $0x3f] sm:$0xff] %vm717_vm3, %v675_v8  ;;  %724 = vst.msk [vmem:[#allocation2 + $0x37] sm:$0xff] %vm717_vm3, %v673_v9 }
  0xec   : > { %1085 = vrot.lane.b32.xlu1 %v3173_v21, %s3853_s20  ;;  %1083 = vrot.lane.b32.xlu0 %v3176_v22, %s3853_s20 }
  0xee   : > { %v754_v11 = vpop.permute.xlu1 %753  ;;  %v752_v12 = vpop.permute.xlu0 %751  ;;  %v1136_v13 = vld [vmem:[#allocation2 + $0x20] sm:$0xff]  ;;  %v1137_v15 = vld [vmem:[#allocation2 + $0x28] sm:$0xff] }
  0xef   : > { %804 = vst.msk [vmem:[#allocation2 + $0x3e] sm:$0xff] %vm796_vm6, %v754_v11  ;;  %803 = vst.msk [vmem:[#allocation2 + $0x36] sm:$0xff] %vm796_vm6, %v752_v12  ;;  %v1152_v16 = vpack.c.bf16 %v1137_v15, %v1136_v13 }
  0xf0   : > { %694 = vrot.lane.b32.xlu1 %v619_v10, %s3877_s27  ;;  %692 = vrot.lane.b32.xlu0 %v3207_v23, %s3877_s27  ;;  %s3880_s27 = sld [smem:[#allocation12_spill]] }
  0xf1   : > { %2589 = vmatmul.mubr.msk.bf16.gmra.mxu0 %vm1194_vm15, %v1152_v16 }
  0xf2   : > { %v833_v17 = vpop.permute.xlu1 %832  ;;  %v831_v18 = vpop.permute.xlu0 %830  ;;  %2592 = vmatprep.mubr.msk.bf16.mxu0 %vm2863_vm2, %v2859_v14 }
  0xf3   : > { %883 = vst.msk [vmem:[#allocation2 + $0x3d] sm:$0xff] %vm875_vm7, %v833_v17  ;;  %882 = vst.msk [vmem:[#allocation2 + $0x35] sm:$0xff] %vm875_vm7, %v831_v18 }
  0xf4   : > { %773 = vrot.lane.b32.xlu1 %v619_v10, %s3878_s29  ;;  %771 = vrot.lane.b32.xlu0 %v3207_v23, %s3878_s29 }
  0xf6   : > { %v912_v19 = vpop.permute.xlu1 %911  ;;  %v910_v20 = vpop.permute.xlu0 %909 }
  0xf7   : > { %962 = vst.msk [vmem:[#allocation2 + $0x3c] sm:$0xff] %vm954_vm10, %v912_v19  ;;  %961 = vst.msk [vmem:[#allocation2 + $0x34] sm:$0xff] %vm954_vm10, %v910_v20 }
  0xf8   : > { %852 = vrot.lane.b32.xlu1 %v619_v10, %s3879_s22  ;;  %850 = vrot.lane.b32.xlu0 %v3207_v23, %s3879_s22  ;;  %s3851_s22 = smov 64  }
  0xfa   : > { %v991_v21 = vpop.permute.xlu1 %990  ;;  %v989_v22 = vpop.permute.xlu0 %988 }
  0xfb   : > { %1041 = vst.msk [vmem:[#allocation2 + $0x3b] sm:$0xff] %vm1033_vm11, %v991_v21  ;;  %1040 = vst.msk [vmem:[#allocation2 + $0x33] sm:$0xff] %vm1033_vm11, %v989_v22 }
  0xfc   : > { %931 = vrot.lane.b32.xlu1 %v619_v10, %s3849_s28  ;;  %929 = vrot.lane.b32.xlu0 %v3207_v23, %s3849_s28 }
  0xfe   : > { %v1070_v24 = vpop.permute.xlu1 %1069  ;;  %v1068_v25 = vpop.permute.xlu0 %1067 }
  0xff   : > { %1120 = vst.msk [vmem:[#allocation2 + $0x3a] sm:$0xff] %vm1112_vm14, %v1070_v24  ;;  %1119 = vst.msk [vmem:[#allocation2 + $0x32] sm:$0xff] %vm1112_vm14, %v1068_v25 }
 0x100   : > { %1010 = vrot.lane.b32.xlu1 %v619_v10, %s2861_s25  ;;  %1008 = vrot.lane.b32.xlu0 %v3207_v23, %s2861_s25  ;;  %s3858_s25 = smov 96  }
 0x102   : > { %v679_v26 = vpop.permute.xlu1 %678  ;;  %v677_v27 = vpop.permute.xlu0 %676 }
 0x103   : > { %727 = vst.msk [vmem:[#allocation2 + $0x4f] sm:$0xff] %vm717_vm3, %v679_v26  ;;  %726 = vst.msk [vmem:[#allocation2 + $0x47] sm:$0xff] %vm717_vm3, %v677_v27 }
 0x104   : > { %1089 = vrot.lane.b32.xlu1 %v619_v10, %s3853_s20  ;;  %1087 = vrot.lane.b32.xlu0 %v3207_v23, %s3853_s20 }
 0x106   : > { %v758_v28 = vpop.permute.xlu1 %757  ;;  %v756_v29 = vpop.permute.xlu0 %755  ;;  %v1138_v30 = vld [vmem:[#allocation2 + $0x30] sm:$0xff]  ;;  %v1139_v31 = vld [vmem:[#allocation2 + $0x38] sm:$0xff] }
 0x107   : > { %806 = vst.msk [vmem:[#allocation2 + $0x4e] sm:$0xff] %vm796_vm6, %v758_v28  ;;  %805 = vst.msk [vmem:[#allocation2 + $0x46] sm:$0xff] %vm796_vm6, %v756_v29  ;;  %v1153_v32 = vpack.c.bf16 %v1139_v31, %v1138_v30 }
 0x109   : > { %2593 = vmatmul.mubr.msk.bf16.gmra.mxu0 %vm1194_vm15, %v1153_v32 }
 0x10a   : > { %v837_v33 = vpop.permute.xlu1 %836  ;;  %v835_v34 = vpop.permute.xlu0 %834  ;;  %2596 = vmatprep.mubr.msk.bf16.mxu0 %vm2863_vm2, %v2859_v14 }
 0x10b   : > { %885 = vst.msk [vmem:[#allocation2 + $0x4d] sm:$0xff] %vm875_vm7, %v837_v33  ;;  %884 = vst.msk [vmem:[#allocation2 + $0x45] sm:$0xff] %vm875_vm7, %v835_v34 }
 0x10e   : > { %v916_v23 = vpop.permute.xlu1 %915  ;;  %v914_v35 = vpop.permute.xlu0 %913 }
 0x10f   : > { %964 = vst.msk [vmem:[#allocation2 + $0x4c] sm:$0xff] %vm954_vm10, %v916_v23  ;;  %963 = vst.msk [vmem:[#allocation2 + $0x44] sm:$0xff] %vm954_vm10, %v914_v35 }
 0x112   : > { %v995_v36 = vpop.permute.xlu1 %994  ;;  %v993_v37 = vpop.permute.xlu0 %992 }
 0x113   : > { %1043 = vst.msk [vmem:[#allocation2 + $0x4b] sm:$0xff] %vm1033_vm11, %v995_v36  ;;  %1042 = vst.msk [vmem:[#allocation2 + $0x43] sm:$0xff] %vm1033_vm11, %v993_v37 }
 0x116   : > { %v1074_v38 = vpop.permute.xlu1 %1073  ;;  %v1072_v39 = vpop.permute.xlu0 %1071 }
 0x117   : > { %1122 = vst.msk [vmem:[#allocation2 + $0x4a] sm:$0xff] %vm1112_vm14, %v1074_v38  ;;  %1121 = vst.msk [vmem:[#allocation2 + $0x42] sm:$0xff] %vm1112_vm14, %v1072_v39  ;;  %v3487_v39 = vld [vmem:[%s3880_s27] ss:$0 sm:$0xff]  ;;  %s3886_s27 = smov 80  }
 0x11a   : > { %v683_v40 = vpop.permute.xlu1 %682  ;;  %v681_v41 = vpop.permute.xlu0 %680 }
 0x11b   : > { %729 = vst.msk [vmem:[#allocation2 + $0x5f] sm:$0xff] %vm717_vm3, %v683_v40  ;;  %728 = vst.msk [vmem:[#allocation2 + $0x57] sm:$0xff] %vm717_vm3, %v681_v41 }
 0x11e   : > { %v762_v42 = vpop.permute.xlu1 %761  ;;  %v760_v43 = vpop.permute.xlu0 %759  ;;  %v1140_v44 = vld [vmem:[#allocation2 + $0x40] sm:$0xff]  ;;  %v1141_v45 = vld [vmem:[#allocation2 + $0x48] sm:$0xff] }
 0x11f   : > { %808 = vst.msk [vmem:[#allocation2 + $0x5e] sm:$0xff] %vm796_vm6, %v762_v42  ;;  %807 = vst.msk [vmem:[#allocation2 + $0x56] sm:$0xff] %vm796_vm6, %v760_v43  ;;  %v1154_v46 = vpack.c.bf16 %v1141_v45, %v1140_v44 }
 0x121   : > { %2597 = vmatmul.mubr.msk.bf16.gmra.mxu0 %vm1194_vm15, %v1154_v46 }
 0x122   : > { %v841_v47 = vpop.permute.xlu1 %840  ;;  %v839_v48 = vpop.permute.xlu0 %838  ;;  %2600 = vmatprep.mubr.msk.bf16.mxu0 %vm2863_vm2, %v2859_v14 }
 0x123   : > { %887 = vst.msk [vmem:[#allocation2 + $0x5d] sm:$0xff] %vm875_vm7, %v841_v47  ;;  %886 = vst.msk [vmem:[#allocation2 + $0x55] sm:$0xff] %vm875_vm7, %v839_v48 }
 0x126   : > { %v920_v49 = vpop.permute.xlu1 %919  ;;  %v918_v50 = vpop.permute.xlu0 %917 }
 0x127   : > { %966 = vst.msk [vmem:[#allocation2 + $0x5c] sm:$0xff] %vm954_vm10, %v920_v49  ;;  %965 = vst.msk [vmem:[#allocation2 + $0x54] sm:$0xff] %vm954_vm10, %v918_v50 }
 0x12a   : > { %v999_v51 = vpop.permute.xlu1 %998  ;;  %v997_v52 = vpop.permute.xlu0 %996 }
 0x12b   : > { %1045 = vst.msk [vmem:[#allocation2 + $0x5b] sm:$0xff] %vm1033_vm11, %v999_v51  ;;  %1044 = vst.msk [vmem:[#allocation2 + $0x53] sm:$0xff] %vm1033_vm11, %v997_v52 }
 0x12e   : > { %v1078_v53 = vpop.permute.xlu1 %1077  ;;  %v1076_v54 = vpop.permute.xlu0 %1075 }
 0x12f   : > { %1124 = vst.msk [vmem:[#allocation2 + $0x5a] sm:$0xff] %vm1112_vm14, %v1078_v53  ;;  %1123 = vst.msk [vmem:[#allocation2 + $0x52] sm:$0xff] %vm1112_vm14, %v1076_v54 }
 0x132   : > { %v687_v55 = vpop.permute.xlu1 %686  ;;  %v685_v56 = vpop.permute.xlu0 %684 }
 0x133   : > { %731 = vst.msk [vmem:[#allocation2 + $0x6f] sm:$0xff] %vm717_vm3, %v687_v55  ;;  %730 = vst.msk [vmem:[#allocation2 + $0x67] sm:$0xff] %vm717_vm3, %v685_v56 }
 0x136   : > { %v766_v57 = vpop.permute.xlu1 %765  ;;  %v764_v58 = vpop.permute.xlu0 %763  ;;  %v1142_v59 = vld [vmem:[#allocation2 + $0x50] sm:$0xff]  ;;  %v1143_v60 = vld [vmem:[#allocation2 + $0x58] sm:$0xff] }
 0x137   : > { %810 = vst.msk [vmem:[#allocation2 + $0x6e] sm:$0xff] %vm796_vm6, %v766_v57  ;;  %809 = vst.msk [vmem:[#allocation2 + $0x66] sm:$0xff] %vm796_vm6, %v764_v58  ;;  %v1155_v61 = vpack.c.bf16 %v1143_v60, %v1142_v59 }
 0x139   : > { %2601 = vmatmul.mubr.msk.bf16.gmra.mxu0 %vm1194_vm15, %v1155_v61 }
 0x13a   : > { %v845_v62 = vpop.permute.xlu1 %844  ;;  %v843_v63 = vpop.permute.xlu0 %842  ;;  %2604 = vmatprep.mubr.msk.bf16.mxu0 %vm2863_vm2, %v2859_v14 }
 0x13b   : > { %889 = vst.msk [vmem:[#allocation2 + $0x6d] sm:$0xff] %vm875_vm7, %v845_v62  ;;  %888 = vst.msk [vmem:[#allocation2 + $0x65] sm:$0xff] %vm875_vm7, %v843_v63 }
 0x13e   : > { %v924_v0 = vpop.permute.xlu1 %923  ;;  %v922_v1 = vpop.permute.xlu0 %921 }
 0x13f   : > { %968 = vst.msk [vmem:[#allocation2 + $0x6c] sm:$0xff] %vm954_vm10, %v924_v0  ;;  %967 = vst.msk [vmem:[#allocation2 + $0x64] sm:$0xff] %vm954_vm10, %v922_v1 }
 0x142   : > { %v1003_v2 = vpop.permute.xlu1 %1002  ;;  %v1001_v3 = vpop.permute.xlu0 %1000 }
 0x143   : > { %1047 = vst.msk [vmem:[#allocation2 + $0x6b] sm:$0xff] %vm1033_vm11, %v1003_v2  ;;  %1046 = vst.msk [vmem:[#allocation2 + $0x63] sm:$0xff] %vm1033_vm11, %v1001_v3 }
 0x146   : > { %v1082_v4 = vpop.permute.xlu1 %1081  ;;  %v1080_v5 = vpop.permute.xlu0 %1079 }
 0x147   : > { %1126 = vst.msk [vmem:[#allocation2 + $0x6a] sm:$0xff] %vm1112_vm14, %v1082_v4  ;;  %1125 = vst.msk [vmem:[#allocation2 + $0x62] sm:$0xff] %vm1112_vm14, %v1080_v5 }
 0x14a   : > { %v691_v6 = vpop.permute.xlu1 %690  ;;  %v689_v7 = vpop.permute.xlu0 %688 }
 0x14b   : > { %733 = vst.msk [vmem:[#allocation2 + $0x7f] sm:$0xff] %vm717_vm3, %v691_v6  ;;  %732 = vst.msk [vmem:[#allocation2 + $0x77] sm:$0xff] %vm717_vm3, %v689_v7 }
 0x14e   : > { %v770_v8 = vpop.permute.xlu1 %769  ;;  %v768_v9 = vpop.permute.xlu0 %767  ;;  %v1144_v10 = vld [vmem:[#allocation2 + $0x60] sm:$0xff]  ;;  %v1145_v11 = vld [vmem:[#allocation2 + $0x68] sm:$0xff] }
 0x14f   : > { %812 = vst.msk [vmem:[#allocation2 + $0x7e] sm:$0xff] %vm796_vm6, %v770_v8  ;;  %811 = vst.msk [vmem:[#allocation2 + $0x76] sm:$0xff] %vm796_vm6, %v768_v9  ;;  %v1156_v12 = vpack.c.bf16 %v1145_v11, %v1144_v10 }
 0x151   : > { %2605 = vmatmul.mubr.msk.bf16.gmra.mxu0 %vm1194_vm15, %v1156_v12 }
 0x152   : > { %v849_v13 = vpop.permute.xlu1 %848  ;;  %v847_v15 = vpop.permute.xlu0 %846  ;;  %2608 = vmatprep.mubr.msk.bf16.mxu0 %vm2863_vm2, %v2859_v14 }
 0x153   : > { %891 = vst.msk [vmem:[#allocation2 + $0x7d] sm:$0xff] %vm875_vm7, %v849_v13  ;;  %890 = vst.msk [vmem:[#allocation2 + $0x75] sm:$0xff] %vm875_vm7, %v847_v15 }
 0x156   : > { %v928_v16 = vpop.permute.xlu1 %927  ;;  %v926_v17 = vpop.permute.xlu0 %925 }
 0x157   : > { %970 = vst.msk [vmem:[#allocation2 + $0x7c] sm:$0xff] %vm954_vm10, %v928_v16  ;;  %969 = vst.msk [vmem:[#allocation2 + $0x74] sm:$0xff] %vm954_vm10, %v926_v17 }
 0x15a   : > { %v1007_v18 = vpop.permute.xlu1 %1006  ;;  %v1005_v19 = vpop.permute.xlu0 %1004 }
 0x15b   : > { %1049 = vst.msk [vmem:[#allocation2 + $0x7b] sm:$0xff] %vm1033_vm11, %v1007_v18  ;;  %1048 = vst.msk [vmem:[#allocation2 + $0x73] sm:$0xff] %vm1033_vm11, %v1005_v19 }
 0x15e   : > { %v1086_v20 = vpop.permute.xlu1 %1085  ;;  %v1084_v21 = vpop.permute.xlu0 %1083 }
 0x15f   : > { %1128 = vst.msk [vmem:[#allocation2 + $0x7a] sm:$0xff] %vm1112_vm14, %v1086_v20  ;;  %1127 = vst.msk [vmem:[#allocation2 + $0x72] sm:$0xff] %vm1112_vm14, %v1084_v21 }
 0x162   : > { %v695_v22 = vpop.permute.xlu1 %694  ;;  %v693_v24 = vpop.permute.xlu0 %692 }
 0x163   : > { %736 = vst.msk [vmem:[#allocation2 + $0x8f] sm:$0x1] %vm735_vm0, %v695_v22  ;;  %vm1502_vm0 = vcmask 523648  }
 0x164   : > { %734 = vst.msk [vmem:[#allocation2 + $0x87] sm:$0xff] %vm717_vm3, %v693_v24  ;;  %vm972_vm3 = vcmask 322816  }
 0x166   : > { %v774_v25 = vpop.permute.xlu1 %773  ;;  %v772_v26 = vpop.permute.xlu0 %771  ;;  %v1146_v27 = vld [vmem:[#allocation2 + $0x70] sm:$0xff]  ;;  %v1147_v28 = vld [vmem:[#allocation2 + $0x78] sm:$0xff] }
 0x167   : > { %815 = vst.msk [vmem:[#allocation2 + $0x8e] sm:$0x3] %vm814_vm1, %v774_v25  ;;  %v1157_v29 = vpack.c.bf16 %v1147_v28, %v1146_v27  ;;  %vm1529_vm1 = vcmask 654848  }
 0x168   : > { %813 = vst.msk [vmem:[#allocation2 + $0x86] sm:$0xff] %vm796_vm6, %v772_v26  ;;  %vm1130_vm6 = vcmask 456064  }
 0x169   : > { %2609 = vmatmul.mubr.msk.bf16.gmra.mxu0 %vm1194_vm15, %v1157_v29 }
 0x16a   : > { %v853_v30 = vpop.permute.xlu1 %852  ;;  %v851_v31 = vpop.permute.xlu0 %850  ;;  %2612 = vmatprep.mubr.msk.bf16.mxu0 %vm2863_vm2, %v2859_v14 }
 0x16b   : > { %894 = vst.msk [vmem:[#allocation2 + $0x8d] sm:$0x7] %vm893_vm4, %v853_v30  ;;  %vm1556_vm4 = vcmask 786048  }
 0x16c   : > { %892 = vst.msk [vmem:[#allocation2 + $0x85] sm:$0xff] %vm875_vm7, %v851_v31  ;;  %vm1349_vm7 = vcmask 130048  }
 0x16e   : > { %v932_v32 = vpop.permute.xlu1 %931  ;;  %v930_v33 = vpop.permute.xlu0 %929 }
 0x16f   : > { %973 = vst.msk [vmem:[#allocation2 + $0x8c] sm:$0xf] %vm972_vm3, %v932_v32  ;;  %vm1583_vm3 = vcmask 917248  }
 0x170   : > { %971 = vst.msk [vmem:[#allocation2 + $0x84] sm:$0xff] %vm954_vm10, %v930_v33  ;;  %vm1500_vm10 = vcmask 523651  }
 0x172   : > { %v1011_v34 = vpop.permute.xlu1 %1010  ;;  %v1009_v23 = vpop.permute.xlu0 %1008 }
 0x173   : > { %1052 = vst.msk [vmem:[#allocation2 + $0x8b] sm:$0x1f] %vm1051_vm5, %v1011_v34  ;;  %vm1420_vm5 = vcmask 123904  }
 0x174   : > { %1050 = vst.msk [vmem:[#allocation2 + $0x83] sm:$0xff] %vm1033_vm11, %v1009_v23  ;;  %vm1527_vm11 = vcmask 654852  }
 0x176   : > { %v1090_v35 = vpop.permute.xlu1 %1089  ;;  %v1088_v36 = vpop.permute.xlu0 %1087 }
 0x177   : > { %1131 = vst.msk [vmem:[#allocation2 + $0x8a] sm:$0x3f] %vm1130_vm6, %v1090_v35  ;;  %vm1661_vm6 = vcmask 916480  }
 0x178   : > { %1129 = vst.msk [vmem:[#allocation2 + $0x82] sm:$0xff] %vm1112_vm14, %v1088_v36  ;;  %vm1448_vm14 = vcmask 261248  }
 0x17f   : > { %v1148_v37 = vld [vmem:[#allocation2 + $0x80] sm:$0xff]  ;;  %v1149_v38 = vld [vmem:[#allocation2 + $0x88] sm:$0xff] }
 0x180   : > { %v1158_v40 = vpack.c.bf16 %v1149_v38, %v1148_v37 }
 0x181   : > { %v1260_v41 = vpop.f32.mrf.mxu0 }
 0x182   : > { %2613 = vmatmul.mubr.msk.bf16.gmra.mxu0 %vm1194_vm15, %v1158_v40  ;;  %v1261_v42 = vadd.f32 %v3487_v39, %v1260_v41  ;;  %vm1475_vm15 = vcmask 392448  }
 0x183   : > { %2678 = vmatprep.mubr.msk.bf16.mxu0 %vm2863_vm2, %v2859_v14  ;;  %v2582_v43 = vpop.f32.mrf.mxu0 }
 0x184   : > { %v1331_v44 = vmax.f32 %v1261_v42, 0.0 }
 0x185   : > { %v1263_v45 = vpop.f32.mrf.mxu0 }
 0x186   : > { %1350 = vst.msk [vmem:[#allocation3] sm:$0xff] %vm1349_vm7, %v1331_v44  ;;  %v1264_v46 = vadd.f32 %v3487_v39, %v1263_v45 }
 0x187   : > { %v2583_v47 = vpop.f32.mrf.mxu0 }
 0x188   : > { %v1332_v48 = vmax.f32 %v1264_v46, 0.0 }
 0x18a   : > { %1351 = vst.msk [vmem:[#allocation3 + $0x8] sm:$0xff] %vm1349_vm7, %v1332_v48 }
 0x199   : > { %v1268_v49 = vpop.f32.mrf.mxu0 }
 0x19a   : > { %v1269_v50 = vadd.f32 %v3487_v39, %v1268_v49 }
 0x19b   : > { %v2586_v51 = vpop.f32.mrf.mxu0 }
 0x19c   : > { %v1333_v52 = vmax.f32 %v1269_v50, 0.0 }
 0x19d   : > { %v1271_v53 = vpop.f32.mrf.mxu0 }
 0x19e   : > { %1352 = vst.msk [vmem:[#allocation3 + $0x10] sm:$0xff] %vm1349_vm7, %v1333_v52  ;;  %v1272_v54 = vadd.f32 %v3487_v39, %v1271_v53 }
 0x19f   : > { %v2587_v55 = vpop.f32.mrf.mxu0 }
 0x1a0   : > { %v1334_v56 = vmax.f32 %v1272_v54, 0.0 }
 0x1a2   : > { %1353 = vst.msk [vmem:[#allocation3 + $0x18] sm:$0xff] %vm1349_vm7, %v1334_v56 }
 0x1a5   : > { %v1368_v57 = vld [vmem:[#allocation3] ss:$3 sm:$0xff]  ;;  %v1380_v58 = vld [vmem:[#allocation3 + $0x1] ss:$3 sm:$0xff]  ;;  %v1392_v60 = vld [vmem:[#allocation3 + $0x2] ss:$3 sm:$0xff] }
 0x1a6   : > { %v1403_v59 = vmax.f32 %v1368_v57, %v1380_v58 }
 0x1a8   : > { %v1409_v61 = vmax.f32 %v1403_v59, %v1392_v60 }
 0x1aa   : > { %1455 = vrot.lane.b32.xlu1 %v1409_v61, %s3849_s28  ;;  %1415 = vst.msk [vmem:[#allocation2] sm:$0xff] %vm1349_vm7, %v1409_v61  ;;  %1428 = vrot.lane.b32.xlu0 %v1409_v61, %s3878_s29 }
 0x1ae   : > { %1509 = vrot.lane.b32.xlu1 %v1409_v61, %s3851_s22  ;;  %1482 = vrot.lane.b32.xlu0 %v1409_v61, %s3853_s20 }
 0x1b1   : > { %v1276_v62 = vpop.f32.mrf.mxu0 }
 0x1b2   : > { %v1277_v63 = vadd.f32 %v3487_v39, %v1276_v62  ;;  %1563 = vrot.lane.b32.xlu1 %v1409_v61, %s3858_s25  ;;  %1536 = vrot.lane.b32.xlu0 %v1409_v61, %s3856_s24 }
 0x1b3   : > { %v2590_v0 = vpop.f32.mrf.mxu0 }
 0x1b4   : > { %v1335_v1 = vmax.f32 %v1277_v63, 0.0 }
 0x1b5   : > { %v1279_v2 = vpop.f32.mrf.mxu0 }
 0x1b6   : > { %1354 = vst.msk [vmem:[#allocation3 + $0x20] sm:$0xff] %vm1349_vm7, %v1335_v1  ;;  %v1280_v3 = vadd.f32 %v3487_v39, %v1279_v2 }
 0x1b7   : > { %v2591_v4 = vpop.f32.mrf.mxu0 }
 0x1b8   : > { %v1336_v5 = vmax.f32 %v1280_v3, 0.0 }
 0x1ba   : > { %1355 = vst.msk [vmem:[#allocation3 + $0x28] sm:$0xff] %vm1349_vm7, %v1336_v5 }
 0x1c1   : > { %v1370_v6 = vld [vmem:[#allocation3 + $0x18] ss:$3 sm:$0xff]  ;;  %v1382_v7 = vld [vmem:[#allocation3 + $0x19] ss:$3 sm:$0xff]  ;;  %v1394_v9 = vld [vmem:[#allocation3 + $0x1a] ss:$3 sm:$0xff] }
 0x1c2   : > { %v1404_v8 = vmax.f32 %v1370_v6, %v1382_v7 }
 0x1c4   : > { %v1410_v10 = vmax.f32 %v1404_v8, %v1394_v9 }
 0x1c6   : > { %1457 = vrot.lane.b32.xlu0 %v1410_v10, %s3849_s28  ;;  %1416 = vst.msk [vmem:[#allocation2 + $0x8] sm:$0xff] %vm1349_vm7, %v1410_v10  ;;  %1430 = vrot.lane.b32.xlu1 %v1410_v10, %s3878_s29 }
 0x1c9   : > { %v1284_v11 = vpop.f32.mrf.mxu0 }
 0x1ca   : > { %v1285_v12 = vadd.f32 %v3487_v39, %v1284_v11  ;;  %1511 = vrot.lane.b32.xlu0 %v1410_v10, %s3851_s22  ;;  %1484 = vrot.lane.b32.xlu1 %v1410_v10, %s3853_s20  ;;  %s3881_s22 = sld [smem:[#allocation13_spill]]  ;;  %s3883_s20 = smov 64  }
 0x1cb   : > { %v2594_v13 = vpop.f32.mrf.mxu0 }
 0x1cc   : > { %v1337_v15 = vmax.f32 %v1285_v12, 0.0 }
 0x1cd   : > { %v1287_v16 = vpop.f32.mrf.mxu0 }
 0x1ce   : > { %1356 = vst.msk [vmem:[#allocation3 + $0x30] sm:$0xff] %vm1349_vm7, %v1337_v15  ;;  %v1288_v17 = vadd.f32 %v3487_v39, %v1287_v16  ;;  %1565 = vrot.lane.b32.xlu0 %v1410_v10, %s3858_s25  ;;  %1538 = vrot.lane.b32.xlu1 %v1410_v10, %s3856_s24  ;;  %s3884_s25 = smov 48   ;;  %s3885_s24 = smov 96  }
 0x1cf   : > { %v2595_v18 = vpop.f32.mrf.mxu0 }
 0x1d0   : > { %v1338_v19 = vmax.f32 %v1288_v17, 0.0  ;;  %v2765_v20 = vld [vmem:[%s3881_s22 + $0x30] sm:$0xff]   ;;  %v2766_v21 = vld [vmem:[%s3881_s22 + $0x28] sm:$0xff]   ;;  %v2767_v26 = vld [vmem:[%s3881_s22 + $0x20] sm:$0xff]  }
 0x1d1   : > { %2617 = vmatpush3.bf16.msra.mxu1 %v2765_v20  ;;  %v2768_v31 = vld [vmem:[%s3881_s22 + $0x18] sm:$0xff]   ;;  %v2769_v33 = vld [vmem:[%s3881_s22 + $0x10] sm:$0xff]   ;;  %v2770_v36 = vld [vmem:[%s3881_s22 + $0x8] sm:$0xff]  }
 0x1d2   : > { %1357 = vst.msk [vmem:[#allocation3 + $0x38] sm:$0xff] %vm1349_vm7, %v1338_v19  ;;  %2618 = vmatprep.subr.bf16.mxu1 %v2859_v14  ;;  %v2771_v40 = vld [vmem:[%s3881_s22] sm:$0xff]  }
 0x1d5   : > { %2619 = vmatpush3.bf16.msra.mxu1 %v2766_v21 }
 0x1d6   : > { %2620 = vmatprep.subr.bf16.mxu1 %v2859_v14 }
 0x1d9   : > { %2621 = vmatpush3.bf16.msra.mxu1 %v2767_v26 }
 0x1da   : > { %2622 = vmatprep.subr.bf16.mxu1 %v2859_v14 }
 0x1dd   : > { %2623 = vmatpush3.bf16.msra.mxu1 %v2768_v31 }
 0x1de   : > { %2624 = vmatprep.subr.bf16.mxu1 %v2859_v14 }
 0x1e1   : > { %v1292_v22 = vpop.f32.mrf.mxu0  ;;  %2625 = vmatpush3.bf16.msra.mxu1 %v2769_v33 }
 0x1e2   : > { %v1293_v24 = vadd.f32 %v3487_v39, %v1292_v22  ;;  %2626 = vmatprep.subr.bf16.mxu1 %v2859_v14 }
 0x1e3   : > { %v2598_v25 = vpop.f32.mrf.mxu0 }
 0x1e4   : > { %v1339_v27 = vmax.f32 %v1293_v24, 0.0 }
 0x1e5   : > { %v1295_v28 = vpop.f32.mrf.mxu0  ;;  %2627 = vmatpush3.bf16.msra.mxu1 %v2770_v36 }
 0x1e6   : > { %1358 = vst.msk [vmem:[#allocation3 + $0x40] sm:$0xff] %vm1349_vm7, %v1339_v27  ;;  %v1296_v29 = vadd.f32 %v3487_v39, %v1295_v28  ;;  %2628 = vmatprep.subr.bf16.mxu1 %v2859_v14 }
 0x1e7   : > { %v2599_v30 = vpop.f32.mrf.mxu0 }
 0x1e8   : > { %v1340_v32 = vmax.f32 %v1296_v29, 0.0 }
 0x1e9   : > { %2629 = vmatpush3.bf16.msra.mxu1 %v2771_v40 }
 0x1ea   : > { %1359 = vst.msk [vmem:[#allocation3 + $0x48] sm:$0xff] %vm1349_vm7, %v1340_v32  ;;  %2642 = vmatprep.subr.bf16.mxu1 %v2859_v14 }
 0x1ed   : > { %v1372_v34 = vld [vmem:[#allocation3 + $0x30] ss:$3 sm:$0xff]  ;;  %v1384_v23 = vld [vmem:[#allocation3 + $0x31] ss:$3 sm:$0xff]  ;;  %v1396_v37 = vld [vmem:[#allocation3 + $0x32] ss:$3 sm:$0xff] }
 0x1ee   : > { %v1405_v35 = vmax.f32 %v1372_v34, %v1384_v23 }
 0x1f0   : > { %v1411_v38 = vmax.f32 %v1405_v35, %v1396_v37 }
 0x1f2   : > { %1459 = vrot.lane.b32.xlu1 %v1411_v38, %s3882_s2  ;;  %1417 = vst.msk [vmem:[#allocation2 + $0x10] sm:$0xff] %vm1349_vm7, %v1411_v38  ;;  %1432 = vrot.lane.b32.xlu0 %v1411_v38, %s3878_s29 }
 0x1f6   : > { %1513 = vrot.lane.b32.xlu1 %v1411_v38, %s3883_s20  ;;  %1486 = vrot.lane.b32.xlu0 %v1411_v38, %s3884_s25 }
 0x1f9   : > { %v1300_v41 = vpop.f32.mrf.mxu0 }
 0x1fa   : > { %v1301_v42 = vadd.f32 %v3487_v39, %v1300_v41  ;;  %1567 = vrot.lane.b32.xlu1 %v1411_v38, %s3885_s24  ;;  %1540 = vrot.lane.b32.xlu0 %v1411_v38, %s3886_s27 }
 0x1fb   : > { %v2602_v43 = vpop.f32.mrf.mxu0 }
 0x1fc   : > { %v1341_v44 = vmax.f32 %v1301_v42, 0.0 }
 0x1fd   : > { %v1303_v45 = vpop.f32.mrf.mxu0 }
 0x1fe   : > { %1360 = vst.msk [vmem:[#allocation3 + $0x50] sm:$0xff] %vm1349_vm7, %v1341_v44  ;;  %v1304_v46 = vadd.f32 %v3487_v39, %v1303_v45 }
 0x1ff   : > { %v2603_v47 = vpop.f32.mrf.mxu0 }
 0x200   : > { %v1342_v48 = vmax.f32 %v1304_v46, 0.0 }
 0x202   : > { %1361 = vst.msk [vmem:[#allocation3 + $0x58] sm:$0xff] %vm1349_vm7, %v1342_v48 }
 0x209   : > { %v1374_v49 = vld [vmem:[#allocation3 + $0x48] ss:$3 sm:$0xff]  ;;  %v1386_v50 = vld [vmem:[#allocation3 + $0x49] ss:$3 sm:$0xff]  ;;  %v1398_v52 = vld [vmem:[#allocation3 + $0x4a] ss:$3 sm:$0xff] }
 0x20a   : > { %v1406_v51 = vmax.f32 %v1374_v49, %v1386_v50 }
 0x20c   : > { %v1412_v53 = vmax.f32 %v1406_v51, %v1398_v52 }
 0x20e   : > { %1434 = vrot.lane.b32.xlu0 %v1412_v53, %s3878_s29  ;;  %1418 = vst.msk [vmem:[#allocation2 + $0x18] sm:$0xff] %vm1349_vm7, %v1412_v53 }
 0x211   : > { %v1308_v54 = vpop.f32.mrf.mxu0 }
 0x212   : > { %v1309_v55 = vadd.f32 %v3487_v39, %v1308_v54  ;;  %1461 = vrot.lane.b32.xlu0 %v1412_v53, %s3882_s2 }
 0x213   : > { %v2606_v56 = vpop.f32.mrf.mxu0 }
 0x214   : > { %v1343_v57 = vmax.f32 %v1309_v55, 0.0 }
 0x215   : > { %v1311_v58 = vpop.f32.mrf.mxu0 }
 0x216   : > { %1362 = vst.msk [vmem:[#allocation3 + $0x60] sm:$0xff] %vm1349_vm7, %v1343_v57  ;;  %v1312_v59 = vadd.f32 %v3487_v39, %v1311_v58  ;;  %1488 = vrot.lane.b32.xlu0 %v1412_v53, %s3884_s25 }
 0x217   : > { %v2607_v60 = vpop.f32.mrf.mxu0 }
 0x218   : > { %v1344_v61 = vmax.f32 %v1312_v59, 0.0 }
 0x21a   : > { %1363 = vst.msk [vmem:[#allocation3 + $0x68] sm:$0xff] %vm1349_vm7, %v1344_v61  ;;  %1515 = vrot.lane.b32.xlu0 %v1412_v53, %s3883_s20 }
 0x21c   : > { %v1456_v62 = vpop.permute.xlu1 %1455  ;;  %v1429_v63 = vpop.permute.xlu0 %1428 }
 0x21d   : > { %1447 = vst.msk [vmem:[#allocation2 - $0x1] sm:$0xfe] %vm1446_vm8, %v1429_v63 }
 0x21e   : > { %1542 = vrot.lane.b32.xlu0 %v1412_v53, %s3886_s27  ;;  %1474 = vst.msk [vmem:[#allocation2 - $0x2] sm:$0xfc] %vm1473_vm9, %v1456_v62 }
 0x220   : > { %v1510_v0 = vpop.permute.xlu1 %1509  ;;  %v1483_v1 = vpop.permute.xlu0 %1482 }
 0x221   : > { %1501 = vst.msk [vmem:[#allocation2 - $0x3] sm:$0xf8] %vm1500_vm10, %v1483_v1  ;;  %vm1453_vm10 = vcmask 256128  }
 0x222   : > { %1569 = vrot.lane.b32.xlu0 %v1412_v53, %s3885_s24  ;;  %1528 = vst.msk [vmem:[#allocation2 - $0x4] sm:$0xf0] %vm1527_vm11, %v1510_v0  ;;  %vm1480_vm11 = vcmask 388352  }
 0x224   : > { %v1564_v2 = vpop.permute.xlu1 %1563  ;;  %v1537_v3 = vpop.permute.xlu0 %1536 }
 0x225   : > { %1555 = vst.msk [vmem:[#allocation2 - $0x5] sm:$0xe0] %vm1554_vm12, %v1537_v3  ;;  %vm1507_vm12 = vcmask 520576  }
 0x226   : > { %1582 = vst.msk [vmem:[#allocation2 - $0x6] sm:$0xc0] %vm1581_vm13, %v1564_v2  ;;  %vm1534_vm13 = vcmask 652800  }
 0x229   : > { %v1316_v4 = vpop.f32.mrf.mxu0 }
 0x22a   : > { %v1317_v5 = vadd.f32 %v3487_v39, %v1316_v4 }
 0x22b   : > { %v2610_v6 = vpop.f32.mrf.mxu0 }
 0x22c   : > { %v1345_v7 = vmax.f32 %v1317_v5, 0.0  ;;  %v2479_v6 = vld [vmem:[%s3887_s4] ss:$0 sm:$0xff]  ;;  %s593_s4 = sand.u32 1, %s2846_s30  }
 0x22d   : > { %v1319_v8 = vpop.f32.mrf.mxu0 }
 0x22e   : > { %1364 = vst.msk [vmem:[#allocation3 + $0x70] sm:$0xff] %vm1349_vm7, %v1345_v7  ;;  %v1320_v9 = vadd.f32 %v3487_v39, %v1319_v8 }
 0x22f   : > { %v2611_v10 = vpop.f32.mrf.mxu0 }
 0x230   : > { %v1346_v11 = vmax.f32 %v1320_v9, 0.0 }
 0x232   : > { %1365 = vst.msk [vmem:[#allocation3 + $0x78] sm:$0xff] %vm1349_vm7, %v1346_v11 }
 0x235   : > { %v1376_v12 = vld [vmem:[#allocation3 + $0x60] ss:$3 sm:$0xff]  ;;  %v1388_v13 = vld [vmem:[#allocation3 + $0x61] ss:$3 sm:$0xff]  ;;  %v1400_v16 = vld [vmem:[#allocation3 + $0x62] ss:$3 sm:$0xff] }
 0x236   : > { %v1407_v15 = vmax.f32 %v1376_v12, %v1388_v13 }
 0x238   : > { %v1458_v17 = vpop.permute.xlu0 %1457  ;;  %v1431_v18 = vpop.permute.xlu1 %1430  ;;  %v1413_v19 = vmax.f32 %v1407_v15, %v1400_v16 }
 0x239   : > { %1449 = vst.msk [vmem:[#allocation2 + $0x7] sm:$0xff] %vm1448_vm14, %v1431_v18 }
 0x23a   : > { %1436 = vrot.lane.b32.xlu1 %v1413_v19, %s3878_s29  ;;  %1419 = vst.msk [vmem:[#allocation2 + $0x20] sm:$0xff] %vm1349_vm7, %v1413_v19 }
 0x23b   : > { %1476 = vst.msk [vmem:[#allocation2 + $0x6] sm:$0xff] %vm1475_vm15, %v1458_v17 }
 0x23c   : > { %v1512_v20 = vpop.permute.xlu0 %1511  ;;  %v1485_v21 = vpop.permute.xlu1 %1484 }
 0x23d   : > { %1503 = vst.msk [vmem:[#allocation2 + $0x5] sm:$0xff] %vm1502_vm0, %v1485_v21 }
 0x23e   : > { %1463 = vrot.lane.b32.xlu1 %v1413_v19, %s3882_s2  ;;  %1530 = vst.msk [vmem:[#allocation2 + $0x4] sm:$0xff] %vm1529_vm1, %v1512_v20 }
 0x240   : > { %v1566_v22 = vpop.permute.xlu0 %1565  ;;  %v1539_v24 = vpop.permute.xlu1 %1538 }
 0x241   : > { %1557 = vst.msk [vmem:[#allocation2 + $0x3] sm:$0xff] %vm1556_vm4, %v1539_v24 }
 0x242   : > { %v1324_v25 = vpop.f32.mrf.mxu0  ;;  %1584 = vst.msk [vmem:[#allocation2 + $0x2] sm:$0xff] %vm1583_vm3, %v1566_v22  ;;  %1490 = vrot.lane.b32.xlu1 %v1413_v19, %s3884_s25 }
 0x243   : > { %v1325_v26 = vadd.f32 %v3487_v39, %v1324_v25  ;;  %v2772_v25 = vld [vmem:[%s3888_s5 + $0x10] sm:$0xff]  }
 0x244   : > { %v2614_v27 = vpop.f32.mrf.mxu0 }
 0x245   : > { %v1347_v28 = vmax.f32 %v1325_v26, 0.0  ;;  %v2773_v26 = vld [vmem:[%s3888_s5 + $0x8] sm:$0xff]  }
 0x246   : > { %v1327_v29 = vpop.f32.mrf.mxu0  ;;  %1517 = vrot.lane.b32.xlu1 %v1413_v19, %s3883_s20 }
 0x247   : > { %1366 = vst.msk [vmem:[#allocation3 + $0x80] sm:$0xff] %vm1349_vm7, %v1347_v28  ;;  %v1328_v30 = vadd.f32 %v3487_v39, %v1327_v29 }
 0x248   : > { %v2615_v31 = vpop.f32.mrf.mxu0 }
 0x249   : > { %v1348_v32 = vmax.f32 %v1328_v30, 0.0  ;;  %v1589_v43 = vld [vmem:[#allocation2] sm:$0xff] }
 0x24a   : > { %1544 = vrot.lane.b32.xlu1 %v1413_v19, %s3886_s27 }
 0x24b   : > { %1367 = vst.msk [vmem:[#allocation3 + $0x88] sm:$0xff] %vm1349_vm7, %v1348_v32 }
 0x24e   : > { %1571 = vrot.lane.b32.xlu1 %v1413_v19, %s3885_s24 }
 0x252   : > { %v1378_v33 = vld [vmem:[#allocation3 + $0x78] ss:$3 sm:$0xff]  ;;  %v1390_v34 = vld [vmem:[#allocation3 + $0x79] ss:$3 sm:$0xff]  ;;  %v1402_v35 = vld [vmem:[#allocation3 + $0x7a] ss:$3 sm:$0xff] }
 0x253   : > { %v1408_v23 = vmax.f32 %v1378_v33, %v1390_v34 }
 0x255   : > { %v1414_v36 = vmax.f32 %v1408_v23, %v1402_v35 }
 0x257   : > { %1465 = vrot.lane.b32.xlu1 %v1414_v36, %s3882_s2  ;;  %1438 = vrot.lane.b32.xlu0 %v1414_v36, %s3878_s29  ;;  %1421 = vst.msk [vmem:[#allocation2 + $0x28] sm:$0x3] %vm1420_vm5, %v1414_v36 }
 0x25b   : > { %1519 = vrot.lane.b32.xlu1 %v1414_v36, %s3883_s20  ;;  %1492 = vrot.lane.b32.xlu0 %v1414_v36, %s3884_s25 }
 0x25f   : > { %1573 = vrot.lane.b32.xlu1 %v1414_v36, %s3885_s24  ;;  %1546 = vrot.lane.b32.xlu0 %v1414_v36, %s3886_s27  ;;  %s2393_s27 = scalar_lea.sflag [#allocation5], %s593_s4 }
 0x264   : > { %v1460_v39 = vpop.permute.xlu1 %1459  ;;  %v1433_v37 = vpop.permute.xlu0 %1432 }
 0x265   : > { %1450 = vst.msk [vmem:[#allocation2 + $0xf] sm:$0xff] %vm1448_vm14, %v1433_v37 }
 0x266   : > { %1477 = vst.msk [vmem:[#allocation2 + $0xe] sm:$0xff] %vm1475_vm15, %v1460_v39 }
 0x268   : > { %v1514_v38 = vpop.permute.xlu1 %1513  ;;  %v1487_v40 = vpop.permute.xlu0 %1486 }
 0x269   : > { %1504 = vst.msk [vmem:[#allocation2 + $0xd] sm:$0xff] %vm1502_vm0, %v1487_v40 }
 0x26a   : > { %1531 = vst.msk [vmem:[#allocation2 + $0xc] sm:$0xff] %vm1529_vm1, %v1514_v38  ;;  %v2774_v38 = vld [vmem:[%s3888_s5] sm:$0xff]  }
 0x26c   : > { %v1568_v41 = vpop.permute.xlu1 %1567  ;;  %v1541_v42 = vpop.permute.xlu0 %1540 }
 0x26d   : > { %1558 = vst.msk [vmem:[#allocation2 + $0xb] sm:$0xff] %vm1556_vm4, %v1541_v42 }
 0x26e   : > { %1585 = vst.msk [vmem:[#allocation2 + $0xa] sm:$0xff] %vm1583_vm3, %v1568_v41 }
 0x275   : > { %v1590_v44 = vld [vmem:[#allocation2 + $0x8] sm:$0xff] }
 0x276   : > { %v1595_v45 = vpack.c.bf16 %v1590_v44, %v1589_v43 }
 0x278   : > { %2631 = vmatmul.mubr.msk.bf16.vlgmr.msra.gmra.mxu1 %vm1661_vm6, %v1595_v45 }
 0x279   : > { %2634 = vmatprep.mubr.msk.bf16.mxu1 %vm2863_vm2, %v2859_v14  ;;  %2643 = vmatpush3.bf16.msra.mxu1 %v2772_v25 }
 0x27a   : > { %2644 = vmatprep.subr.bf16.mxu1 %v2859_v14 }
 0x27d   : > { %2645 = vmatpush3.bf16.msra.mxu1 %v2773_v26 }
 0x27e   : > { %2646 = vmatprep.subr.bf16.mxu1 %v2859_v14 }
 0x280   : > { %v1435_v46 = vpop.permute.xlu0 %1434 }
 0x281   : > { %1451 = vst.msk [vmem:[#allocation2 + $0x17] sm:$0xff] %vm1448_vm14, %v1435_v46  ;;  %2647 = vmatpush3.bf16.msra.mxu1 %v2774_v38 }
 0x282   : > { %2652 = vmatprep.subr.bf16.mxu1 %v2859_v14 }
 0x284   : > { %v1462_v47 = vpop.permute.xlu0 %1461 }
 0x285   : > { %1478 = vst.msk [vmem:[#allocation2 + $0x16] sm:$0xff] %vm1475_vm15, %v1462_v47 }
 0x288   : > { %v1489_v48 = vpop.permute.xlu0 %1488 }
 0x289   : > { %1505 = vst.msk [vmem:[#allocation2 + $0x15] sm:$0xff] %vm1502_vm0, %v1489_v48 }
 0x28c   : > { %v1516_v49 = vpop.permute.xlu0 %1515 }
 0x28d   : > { %1532 = vst.msk [vmem:[#allocation2 + $0x14] sm:$0xff] %vm1529_vm1, %v1516_v49 }
 0x290   : > { %v1543_v50 = vpop.permute.xlu0 %1542 }
 0x291   : > { %1559 = vst.msk [vmem:[#allocation2 + $0x13] sm:$0xff] %vm1556_vm4, %v1543_v50 }
 0x294   : > { %v1570_v51 = vpop.permute.xlu0 %1569 }
 0x295   : > { %1586 = vst.msk [vmem:[#allocation2 + $0x12] sm:$0xff] %vm1583_vm3, %v1570_v51 }
 0x29c   : > { %v1591_v60 = vld [vmem:[#allocation2 + $0x10] sm:$0xff] }
 0x2ac   : > { %v1437_v52 = vpop.permute.xlu1 %1436 }
 0x2ad   : > { %1452 = vst.msk [vmem:[#allocation2 + $0x1f] sm:$0xff] %vm1448_vm14, %v1437_v52  ;;  %vm1561_vm14 = vcmask 785024   ;;  %v2775_v52 = vld [vmem:[%s3889_s7 + $0x10] sm:$0xff]  }
 0x2b0   : > { %v1464_v53 = vpop.permute.xlu1 %1463 }
 0x2b1   : > { %1479 = vst.msk [vmem:[#allocation2 + $0x1e] sm:$0xff] %vm1475_vm15, %v1464_v53  ;;  %vm1751_vm15 = vcmask 125952   ;;  %v2490_v53 = vld [vmem:[%s3890_s6] ss:$0 sm:$0xff]  ;;  %s2798_s6 = sshll.u32 %s2867_s23, 4  ;;  %s2799_s6 = int_to_ptr.vmem [resolvable:$false] %s2798_s6 }
 0x2b4   : > { %v1491_v54 = vpop.permute.xlu1 %1490 }
 0x2b5   : > { %1506 = vst.msk [vmem:[#allocation2 + $0x1d] sm:$0xff] %vm1502_vm0, %v1491_v54  ;;  %vm1762_vm0 = vcmask 258176  }
 0x2b8   : > { %v1518_v55 = vpop.permute.xlu1 %1517 }
 0x2b9   : > { %1533 = vst.msk [vmem:[#allocation2 + $0x1c] sm:$0xff] %vm1529_vm1, %v1518_v55  ;;  %vm1771_vm1 = vcmask 390400   ;;  %v2776_v55 = vld [vmem:[%s3889_s7 + $0x8] sm:$0xff]  }
 0x2bc   : > { %v1545_v56 = vpop.permute.xlu1 %1544 }
 0x2bd   : > { %1560 = vst.msk [vmem:[#allocation2 + $0x1b] sm:$0xff] %vm1556_vm4, %v1545_v56  ;;  %vm1807_vm4 = vcmask 392192  }
 0x2c0   : > { %v1572_v57 = vpop.permute.xlu1 %1571 }
 0x2c1   : > { %1587 = vst.msk [vmem:[#allocation2 + $0x1a] sm:$0xff] %vm1583_vm3, %v1572_v57 }
 0x2c8   : > { %v1592_v61 = vld [vmem:[#allocation2 + $0x18] sm:$0xff] }
 0x2c9   : > { %v1466_v58 = vpop.permute.xlu1 %1465  ;;  %v1439_v59 = vpop.permute.xlu0 %1438  ;;  %v1596_v62 = vpack.c.bf16 %v1592_v61, %v1591_v60 }
 0x2ca   : > { %1454 = vst.msk [vmem:[#allocation2 + $0x27] sm:$0x7] %vm1453_vm10, %v1439_v59 }
 0x2cb   : > { %1481 = vst.msk [vmem:[#allocation2 + $0x26] sm:$0xf] %vm1480_vm11, %v1466_v58  ;;  %2635 = vmatmul.mubr.msk.bf16.gmra.mxu1 %vm1661_vm6, %v1596_v62  ;;  %v2777_v58 = vld [vmem:[%s3889_s7] sm:$0xff]  }
 0x2cc   : > { %2638 = vmatprep.mubr.msk.bf16.mxu1 %vm2863_vm2, %v2859_v14 }
 0x2cd   : > { %v1520_v63 = vpop.permute.xlu1 %1519  ;;  %v1493_v0 = vpop.permute.xlu0 %1492 }
 0x2ce   : > { %1508 = vst.msk [vmem:[#allocation2 + $0x25] sm:$0x1f] %vm1507_vm12, %v1493_v0 }
 0x2cf   : > { %1535 = vst.msk [vmem:[#allocation2 + $0x24] sm:$0x3f] %vm1534_vm13, %v1520_v63 }
 0x2d1   : > { %v1574_v1 = vpop.permute.xlu1 %1573  ;;  %v1547_v2 = vpop.permute.xlu0 %1546 }
 0x2d2   : > { %1562 = vst.msk [vmem:[#allocation2 + $0x23] sm:$0x7f] %vm1561_vm14, %v1547_v2 }
 0x2d3   : > { %1588 = vst.msk [vmem:[#allocation2 + $0x22] sm:$0xff] %vm1583_vm3, %v1574_v1  ;;  %vm1964_vm3 = vcmask 254080  }
 0x2da   : > { %v1593_v3 = vld [vmem:[#allocation2 + $0x20] sm:$0xff]  ;;  %v1594_v4 = vld [vmem:[#allocation2 + $0x28] sm:$0x3] }
 0x2db   : > { %v1597_v5 = vpack.c.bf16 %v1594_v4, %v1593_v3 }
 0x2dd   : > { %2639 = vmatmul.mubr.msk.bf16.gmra.mxu1 %vm1661_vm6, %v1597_v5  ;;  %vm2058_vm6 = vcmask 260225  }
 0x2de   : > { %2648 = vmatprep.mubr.msk.bf16.mxu1 %vm2863_vm2, %v2859_v14 }
 0x338   : > { %v1705_v7 = vpop.f32.mrf.mxu1 }
 0x339   : > { %v1706_v8 = vadd.f32 %v2479_v6, %v1705_v7  ;;  %v2778_v7 = vld [vmem:[%s3829_s9 + $0x10] sm:$0xff]  }
 0x33a   : > { %v2632_v9 = vpop.f32.mrf.mxu1 }
 0x33b   : > { %v1728_v10 = vmax.f32 %v1706_v8, 0.0  ;;  %v2495_v8 = vld [vmem:[%s3828_s8] ss:$0 sm:$0xff] }
 0x33c   : > { %v1708_v11 = vpop.f32.mrf.mxu1 }
 0x33d   : > { %1734 = vst.msk [vmem:[#allocation3] sm:$0xff] %vm1349_vm7, %v1728_v10  ;;  %v1709_v12 = vadd.f32 %v2479_v6, %v1708_v11  ;;  %v2779_v10 = vld [vmem:[%s3829_s9 + $0x8] sm:$0xff]  }
 0x33e   : > { %v2633_v13 = vpop.f32.mrf.mxu1 }
 0x33f   : > { %v1729_v15 = vmax.f32 %v1709_v12, 0.0  ;;  %v2780_v13 = vld [vmem:[%s3829_s9] sm:$0xff]  }
 0x341   : > { %1735 = vst.msk [vmem:[#allocation3 + $0x8] sm:$0xff] %vm1349_vm7, %v1729_v15 }
 0x38b   : > { %v1713_v16 = vpop.f32.mrf.mxu1 }
 0x38c   : > { %v1714_v17 = vadd.f32 %v2479_v6, %v1713_v16 }
 0x38d   : > { %v2636_v18 = vpop.f32.mrf.mxu1 }
 0x38e   : > { %v1730_v19 = vmax.f32 %v1714_v17, 0.0 }
 0x38f   : > { %v1716_v20 = vpop.f32.mrf.mxu1 }
 0x390   : > { %1736 = vst.msk [vmem:[#allocation3 + $0x10] sm:$0xff] %vm1349_vm7, %v1730_v19  ;;  %v1717_v21 = vadd.f32 %v2479_v6, %v1716_v20 }
 0x391   : > { %v2637_v22 = vpop.f32.mrf.mxu1 }
 0x392   : > { %v1731_v24 = vmax.f32 %v1717_v21, 0.0 }
 0x394   : > { %1737 = vst.msk [vmem:[#allocation3 + $0x18] sm:$0xff] %vm1349_vm7, %v1731_v24 }
 0x397   : > { %v1740_v27 = vld [vmem:[#allocation3] ss:$3 sm:$0xff]  ;;  %v1742_v28 = vld [vmem:[#allocation3 + $0x1] ss:$3 sm:$0xff]  ;;  %v1744_v30 = vld [vmem:[#allocation3 + $0x2] ss:$3 sm:$0xff] }
 0x398   : > { %v1746_v29 = vmax.f32 %v1740_v27, %v1742_v28  ;;  %v2781_v27 = vld [vmem:[%s3831_s11 + $0x10] sm:$0xff]   ;;  %v2782_v28 = vld [vmem:[%s3831_s11 + $0x8] sm:$0xff]  }
 0x399   : > { %2673 = vmatpush3.bf16.msra.mxu0 %v2781_v27 }
 0x39a   : > { %v1748_v31 = vmax.f32 %v1746_v29, %v1744_v30  ;;  %2674 = vmatprep.subr.bf16.mxu0 %v2859_v14  ;;  %v2783_v29 = vld [vmem:[%s3831_s11] sm:$0xff]  }
 0x39b   : > { %v2500_v30 = vld [vmem:[%s3830_s10] ss:$0 sm:$0xff] }
 0x39c   : > { %1755 = vrot.lane.b32.xlu0 %v1748_v31, %s3878_s29  ;;  %1750 = vst.msk [vmem:[#allocation2] sm:$0xff] %vm1349_vm7, %v1748_v31 }
 0x39d   : > { %v1721_v32 = vpop.f32.mrf.mxu1  ;;  %2675 = vmatpush3.bf16.msra.mxu0 %v2782_v28 }
 0x39e   : > { %v1722_v33 = vadd.f32 %v2479_v6, %v1721_v32  ;;  %2676 = vmatprep.subr.bf16.mxu0 %v2859_v14 }
 0x39f   : > { %v2640_v34 = vpop.f32.mrf.mxu1 }
 0x3a0   : > { %v1732_v23 = vmax.f32 %v1722_v33, 0.0  ;;  %1764 = vrot.lane.b32.xlu0 %v1748_v31, %s3882_s2 }
 0x3a1   : > { %v1724_v35 = vpop.f32.mrf.mxu1  ;;  %2677 = vmatpush3.bf16.msra.mxu0 %v2783_v29 }
 0x3a2   : > { %1738 = vst.msk [vmem:[#allocation3 + $0x20] sm:$0xff] %vm1349_vm7, %v1732_v23  ;;  %v1725_v36 = vadd.f32 %v2479_v6, %v1724_v35  ;;  %2694 = vmatprep.subr.bf16.mxu0 %v2859_v14 }
 0x3a3   : > { %v2641_v39 = vpop.f32.mrf.mxu1 }
 0x3a4   : > { %v1733_v37 = vmax.f32 %v1725_v36, 0.0 }
 0x3a6   : > { %1739 = vst.msk [vmem:[#allocation3 + $0x28] sm:$0x3] %vm1420_vm5, %v1733_v37 }
 0x3a9   : > { %v1741_v40 = vld [vmem:[#allocation3 + $0x18] ss:$3 sm:$0x3f] }
 0x3ad   : > { %v1743_v41 = vld [vmem:[#allocation3 + $0x19] ss:$3 sm:$0x3f]  ;;  %v1745_v43 = vld [vmem:[#allocation3 + $0x1a] ss:$3 sm:$0x3f] }
 0x3ae   : > { %v1747_v42 = vmax.f32 %v1741_v40, %v1743_v41  ;;  %v2784_v40 = vld [vmem:[%s3833_s13 + $0x8] sm:$0xff]   ;;  %v2505_v41 = vld [vmem:[%s3832_s12] ss:$0 sm:$0xff] }
 0x3b0   : > { %v1749_v44 = vmax.f32 %v1747_v42, %v1745_v43 }
 0x3b2   : > { %1757 = vrot.lane.b32.xlu1 %v1749_v44, %s3878_s29  ;;  %1752 = vst.msk [vmem:[#allocation2 + $0x8] sm:$0xf] %vm1751_vm15, %v1749_v44 }
 0x3b6   : > { %1766 = vrot.lane.b32.xlu1 %v1749_v44, %s3882_s2 }
 0x40e   : > { %v1756_v45 = vpop.permute.xlu0 %1755 }
 0x40f   : > { %1761 = vst.msk [vmem:[#allocation2 - $0x1] sm:$0xfe] %vm1446_vm8, %v1756_v45 }
 0x412   : > { %v1765_v46 = vpop.permute.xlu0 %1764 }
 0x413   : > { %1770 = vst.msk [vmem:[#allocation2 - $0x2] sm:$0xfc] %vm1473_vm9, %v1765_v46 }
 0x424   : > { %v1758_v47 = vpop.permute.xlu1 %1757 }
 0x425   : > { %1763 = vst.msk [vmem:[#allocation2 + $0x7] sm:$0x1f] %vm1762_vm0, %v1758_v47 }
 0x428   : > { %v1767_v48 = vpop.permute.xlu1 %1766 }
 0x429   : > { %1772 = vst.msk [vmem:[#allocation2 + $0x6] sm:$0x3f] %vm1771_vm1, %v1767_v48 }
 0x430   : > { %v1773_v49 = vld [vmem:[#allocation2] sm:$0xff]  ;;  %v1774_v50 = vld [vmem:[#allocation2 + $0x8] sm:$0xf] }
 0x431   : > { %v1775_v51 = vpack.c.bf16 %v1774_v50, %v1773_v49 }
 0x433   : > { %2649 = vmatmul.mubr.msk.bf16.vlgmr.msra.gmra.mxu1 %vm1807_vm4, %v1775_v51 }
 0x434   : > { %2658 = vmatprep.mubr.msk.bf16.mxu1 %vm2863_vm2, %v2859_v14  ;;  %2653 = vmatpush3.bf16.msra.mxu1 %v2775_v52 }
 0x435   : > { %2654 = vmatprep.subr.bf16.mxu1 %v2859_v14 }
 0x438   : > { %2655 = vmatpush3.bf16.msra.mxu1 %v2776_v55 }
 0x439   : > { %2656 = vmatprep.subr.bf16.mxu1 %v2859_v14 }
 0x43c   : > { %2657 = vmatpush3.bf16.msra.mxu1 %v2777_v58  ;;  %v2788_v58 = vld [vmem:[%s3837_s17 + $0x8] sm:$0xff]  }
 0x43d   : > { %2662 = vmatprep.subr.bf16.mxu1 %v2859_v14 }
 0x4f3   : > { %v1845_v54 = vpop.f32.mrf.mxu1 }
 0x4f4   : > { %v1846_v56 = vadd.f32 %v2490_v53, %v1845_v54  ;;  %v2785_v54 = vld [vmem:[%s3833_s13] sm:$0xff]  }
 0x4f5   : > { %v2650_v57 = vpop.f32.mrf.mxu1 }
 0x4f6   : > { %v1852_v59 = vmax.f32 %v1846_v56, 0.0  ;;  %v2786_v56 = vld [vmem:[%s3835_s15 + $0x8] sm:$0xff]   ;;  %v2787_v57 = vld [vmem:[%s3835_s15] sm:$0xff]  }
 0x4f7   : > { %v1848_v60 = vpop.f32.mrf.mxu1 }
 0x4f8   : > { %1854 = vst.msk [vmem:[#allocation2] sm:$0xff] %vm1349_vm7, %v1852_v59  ;;  %v1849_v61 = vadd.f32 %v2490_v53, %v1848_v60  ;;  %1858 = vrot.lane.b32.xlu0 %v1852_v59, %s3878_s29 }
 0x4f9   : > { %v2651_v62 = vpop.f32.mrf.mxu1 }
 0x4fa   : > { %v1853_v63 = vmax.f32 %v1849_v61, 0.0 }
 0x4fc   : > { %1855 = vst.msk [vmem:[#allocation2 + $0x8] sm:$0x3] %vm1420_vm5, %v1853_v63  ;;  %1866 = vrot.lane.b32.xlu0 %v1852_v59, %s3882_s2  ;;  %1860 = vrot.lane.b32.xlu1 %v1853_v63, %s3878_s29  ;;  %vm1973_vm5 = vcmask 386304  }
 0x500   : > { %1868 = vrot.lane.b32.xlu1 %v1853_v63, %s3882_s2 }
 0x56a   : > { %v1859_v0 = vpop.permute.xlu0 %1858 }
 0x56b   : > { %1864 = vst.msk [vmem:[#allocation2 - $0x1] sm:$0xfe] %vm1446_vm8, %v1859_v0  ;;  %v2252_v0 = vld [vmem:[%s3834_s14] sm:$0x1] }
 0x56e   : > { %v1867_v1 = vpop.permute.xlu0 %1866  ;;  %v1861_v2 = vpop.permute.xlu1 %1860 }
 0x56f   : > { %1872 = vst.msk [vmem:[#allocation2 - $0x2] sm:$0xfc] %vm1473_vm9, %v1867_v1 }
 0x570   : > { %1865 = vst.msk [vmem:[#allocation2 + $0x7] sm:$0x7] %vm1453_vm10, %v1861_v2 }
 0x572   : > { %v1869_v3 = vpop.permute.xlu1 %1868 }
 0x573   : > { %1873 = vst.msk [vmem:[#allocation2 + $0x6] sm:$0xf] %vm1480_vm11, %v1869_v3 }
 0x57a   : > { %v1874_v4 = vld [vmem:[#allocation2] sm:$0xff]  ;;  %v1875_v5 = vld [vmem:[#allocation2 + $0x8] sm:$0x3] }
 0x57b   : > { %v1876_v6 = vpack.c.bf16 %v1875_v5, %v1874_v4 }
 0x57d   : > { %2659 = vmatmul.mubr.msk.bf16.vlgmr.msra.gmra.mxu1 %vm1807_vm4, %v1876_v6 }
 0x57e   : > { %2668 = vmatprep.mubr.msk.bf16.mxu1 %vm2863_vm2, %v2859_v14  ;;  %2663 = vmatpush3.bf16.msra.mxu1 %v2778_v7 }
 0x57f   : > { %2664 = vmatprep.subr.bf16.mxu1 %v2859_v14 }
 0x582   : > { %2665 = vmatpush3.bf16.msra.mxu1 %v2779_v10 }
 0x583   : > { %2666 = vmatprep.subr.bf16.mxu1 %v2859_v14 }
 0x586   : > { %2667 = vmatpush3.bf16.msra.mxu1 %v2780_v13 }
 0x587   : > { %2682 = vmatprep.subr.bf16.mxu1 %v2859_v14 }
 0x63d   : > { %v1945_v9 = vpop.f32.mrf.mxu1 }
 0x63e   : > { %v1946_v11 = vadd.f32 %v2495_v8, %v1945_v9 }
 0x63f   : > { %v2660_v12 = vpop.f32.mrf.mxu1 }
 0x640   : > { %v1952_v15 = vmax.f32 %v1946_v11, 0.0 }
 0x641   : > { %v1948_v16 = vpop.f32.mrf.mxu1 }
 0x642   : > { %1954 = vst.msk [vmem:[#allocation2] sm:$0xff] %vm1349_vm7, %v1952_v15  ;;  %v1949_v17 = vadd.f32 %v2495_v8, %v1948_v16  ;;  %1957 = vrot.lane.b32.xlu0 %v1952_v15, %s3878_s29  ;;  %v2260_v8 = vld [vmem:[%s3836_s16] sm:$0x1] }
 0x643   : > { %v2661_v18 = vpop.f32.mrf.mxu1 }
 0x644   : > { %v1953_v19 = vmax.f32 %v1949_v17, 0.0  ;;  %v2323_v17 = vld [vmem:[%s3838_s18] sm:$0x1] }
 0x646   : > { %1966 = vrot.lane.b32.xlu0 %v1952_v15, %s3882_s2  ;;  %1959 = vrot.lane.b32.xlu1 %v1953_v19, %s3878_s29 }
 0x64a   : > { %1968 = vrot.lane.b32.xlu1 %v1953_v19, %s3882_s2 }
 0x6b4   : > { %v1958_v20 = vpop.permute.xlu0 %1957 }
 0x6b5   : > { %1963 = vst.msk [vmem:[#allocation2 - $0x1] sm:$0xfe] %vm1446_vm8, %v1958_v20  ;;  %vm2052_vm8 = vcmask 128000  }
 0x6b8   : > { %v1967_v21 = vpop.permute.xlu0 %1966  ;;  %v1960_v22 = vpop.permute.xlu1 %1959 }
 0x6b9   : > { %1972 = vst.msk [vmem:[#allocation2 - $0x2] sm:$0xfc] %vm1473_vm9, %v1967_v21 }
 0x6ba   : > { %1965 = vst.msk [vmem:[#allocation2 + $0x7] sm:$0x1] %vm1964_vm3, %v1960_v22 }
 0x6bc   : > { %v1969_v24 = vpop.permute.xlu1 %1968 }
 0x6bd   : > { %1974 = vst.msk [vmem:[#allocation2 + $0x6] sm:$0x3] %vm1973_vm5, %v1969_v24 }
 0x6c4   : > { %v1975_v25 = vld [vmem:[#allocation2] sm:$0xff] }
 0x6c5   : > { %v1976_v26 = vpack.c.bf16 %v1975_v25, %v1975_v25 }
 0x6c7   : > { %2669 = vmatmul.mubr.msk.bf16.vlgmr.msra.gmra.mxu1 %vm1807_vm4, %v1976_v26 }
 0x6c8   : > { %2684 = vmatprep.mubr.msk.bf16.mxu1 %vm2863_vm2, %v2859_v14  ;;  %2683 = vmatpush3.bf16.msra.mxu1 %v2784_v40 }
 0x6c9   : > { %2688 = vmatprep.subr.bf16.mxu1 %v2859_v14 }
 0x787   : > { %v2045_v31 = vpop.f32.mrf.mxu1 }
 0x788   : > { %v2046_v32 = vadd.f32 %v2500_v30, %v2045_v31 }
 0x789   : > { %v2670_v33 = vpop.f32.mrf.mxu1 }
 0x78a   : > { %v2051_v34 = vmax.f32 %v2046_v32, 0.0 }
 0x78b   : > { %v2048_v23 = vpop.f32.mrf.mxu1 }
 0x78c   : > { %2060 = vrot.lane.b32.xlu1 %v2051_v34, %s3882_s2  ;;  %2055 = vrot.lane.b32.xlu0 %v2051_v34, %s3878_s29  ;;  %2053 = vst.msk [vmem:[#allocation2] sm:$0x3f] %vm2052_vm8, %v2051_v34  ;;  %s2520_s2 = sshll.u32 %s2989_s1, 4  ;;  %s594_s29 = scalar_lea.vmem [#allocation4], %s593_s4 }
 0x78d   : > { %v2671_v35 = vpop.f32.mrf.mxu1  ;;  %s2405_s5 = sshll.u32 %s594_s29, 4  ;;  %s2403_s24 = scalar_lea.hbm %s3839_s19, %s2520_s2  ;;  %s2406_s5 = int_to_ptr.vmem [resolvable:$true] %s2405_s5 }
 0x78e   : > { %s2794_s28 = scalar_lea.vmem %s2406_s5, 16  ;;  %s2800_s1 = scalar_lea.vmem %s2799_s6, 32 }
 0x78f   : > { %p2795_p11 = scmp.ne.s32.totalorder %s2406_s5, %s2794_s28  ;;  %p2801_p0 = scmp.lt.s32.totalorder %s2406_s5, %s2799_s6 }
 0x790   : > { %p2802_p1 = scmp.lt.s32.totalorder %s2800_s1, %s2794_s28 }
 0x791   : > { %p2796_p12 = pnand %p2795_p11, %p3006_p5 }
 0x792   : > { %p2803_p2 = por %p2802_p1, %p2801_p0 }
 0x793   : > { %p2797_p13 = pneg %p2796_p12 }
 0x795   : > { %p2804_p3 = pnand %p2803_p2, %p2797_p13 }
 0x7fe   : > { %v2061_v36 = vpop.permute.xlu1 %2060  ;;  %v2056_v39 = vpop.permute.xlu0 %2055 }
 0x7ff   : > { %2059 = vst.msk [vmem:[#allocation2 - $0x1] sm:$0x7e] %vm2058_vm6, %v2056_v39 }
 0x800   : > { %2063 = vst.msk [vmem:[#allocation2 - $0x2] sm:$0xfc] %vm1473_vm9, %v2061_v36 }
 0x807   : > { %v2064_v37 = vld [vmem:[#allocation2] sm:$0x3f] }
 0x808   : > { %v2065_v38 = vpack.c.bf16 %v2064_v37, %v2064_v37 }
 0x80a   : > { %2679 = vmatmul.mubr.msk.bf16.vlgmr.msra.gmra.mxu0 %vm1807_vm4, %v2065_v38 }
 0x80b   : > { %2698 = vmatprep.mubr.msk.bf16.mxu0 %vm2863_vm2, %v2859_v14  ;;  %2695 = vmatpush3.bf16.msra.mxu0 %v2786_v56 }
 0x80c   : > { %2696 = vmatprep.subr.bf16.mxu0 %v2859_v14 }
 0x80f   : > { %2697 = vmatpush3.bf16.msra.mxu0 %v2787_v57 }
 0x8ca   : > { %v2134_v42 = vpop.f32.mrf.mxu0 }
 0x8cb   : > { %v2135_v43 = vadd.f32 %v2505_v41, %v2134_v42 }
 0x8cc   : > { %v2680_v44 = vpop.f32.mrf.mxu0 }
 0x8cd   : > { %v2140_v45 = vmax.f32 %v2135_v43, 0.0 }
 0x8ce   : > { %v2137_v46 = vpop.f32.mrf.mxu0 }
 0x8cf   : > { %2141 = vst.msk [vmem:[#allocation3] sm:$0x3f] %vm2052_vm8, %v2140_v45 }
 0x8d0   : > { %v2681_v47 = vpop.f32.mrf.mxu0 }
 0x8d6   : > { %v2142_v48 = vld [vmem:[#allocation3] ss:$3 sm:$0x3]  ;;  %v2143_v49 = vld [vmem:[#allocation3 + $0x1] ss:$3 sm:$0x3] }
 0x8d7   : > { %v2145_v50 = vmax.f32 %v2142_v48, %v2143_v49  ;;  %v2144_v51 = vld [vmem:[#allocation3 + $0x2] ss:$3 sm:$0x3] }
 0x8d9   : > { %v2146_v52 = vmax.f32 %v2145_v50, %v2144_v51 }
 0x8db   : > { %v2147_v53 = vpack.c.bf16 %v2146_v52, %v2146_v52 }
 0x8dd   : > { %v2153_v55 = vshrl.u32 %v2147_v53, 16 }
 0x8df   : > { %2685 = vmatmul.mubr.msk.bf16.vlgmr.msra.gmra.mxu1 %vm1349_vm7, %v2153_v55 }
 0x8e0   : > { %2689 = vmatpush3.bf16.msra.mxu1 %v2785_v54  ;;  %2690 = vmatprep.mubr.msk.bf16.mxu1 %vm2863_vm2, %v2859_v14 }
 0x8e1   : > { %2702 = vmatprep.subr.bf16.mxu1 %v2859_v14 }
 0x8e7   : > { %2691 = vmatmul.mubr.msk.bf16.vlgmr.msra.gmra.mxu1 %vm1349_vm7, %v2147_v53  ;;  %vm2379_vm7 = vcmask 24576  }
 0x8e8   : > { %2706 = vmatprep.mubr.msk.bf16.mxu1 %vm2863_vm2, %v2859_v14  ;;  %2703 = vmatpush3.bf16.msra.mxu1 %v2788_v58  ;;  %vm2273_vm2 = vcmask 261120  }
 0x8e9   : > { %2704 = vmatprep.subr.bf16.mxu1 %v2859_v14  ;;  %v2789_v14 = vld [vmem:[%s3837_s17] sm:$0xff]  }
 0x8ec   : > { %2705 = vmatpush3.bf16.msra.mxu1 %v2789_v14 }
 0x99f   : > { %v2198_v59 = vpop.f32.mrf.mxu1 }
 0x9a1   : > { %v2686_v60 = vpop.f32.mrf.mxu1 }
 0x9a3   : > { %v2201_v61 = vpop.f32.mrf.mxu1 }
 0x9a5   : > { %v2687_v62 = vpop.f32.mrf.mxu1 }
 0x9a7   : > { %v2246_v63 = vpop.f32.mrf.mxu1 }
 0x9a8   : > { %v2247_v1 = vadd.f32 %v2246_v63, %v2198_v59 }
 0x9a9   : > { %v2692_v2 = vpop.f32.mrf.mxu1 }
 0x9aa   : > { %v2253_v3 = vadd.f32 %v2252_v0, %v2247_v1 }
 0x9ab   : > { %v2249_v4 = vpop.f32.mrf.mxu1 }
 0x9ac   : > { %v2254_v5 = vmax.f32 %v2253_v3, 0.0 }
 0x9ad   : > { %v2693_v6 = vpop.f32.mrf.mxu1 }
 0x9ae   : > { %v2255_v7 = vpack.c.bf16 %v2254_v5, %v2254_v5 }
 0x9b0   : > { %2699 = vmatmul.mubr.msk.bf16.vlgmr.msra.gmra.mxu0 %vm2273_vm2, %v2255_v7 }
 0xa70   : > { %v2311_v9 = vpop.f32.mrf.mxu0 }
 0xa71   : > { %v2312_v10 = vadd.f32 %v2311_v9, %v2260_v8 }
 0xa72   : > { %v2700_v11 = vpop.f32.mrf.mxu0 }
 0xa73   : > { %v2317_v12 = vmax.f32 %v2312_v10, 0.0 }
 0xa74   : > { %v2314_v13 = vpop.f32.mrf.mxu0 }
 0xa75   : > { %v2318_v15 = vpack.c.bf16 %v2317_v12, %v2317_v12 }
 0xa76   : > { %v2701_v16 = vpop.f32.mrf.mxu0 }
 0xa77   : > { %2707 = vmatmul.mubr.msk.bf16.vlgmr.msra.gmra.mxu1 %vm2273_vm2, %v2318_v15 }
 0xb37   : > { %v2373_v18 = vpop.f32.mrf.mxu1 }
 0xb38   : > { %v2374_v19 = vadd.f32 %v2373_v18, %v2323_v17 }
 0xb39   : > { %v2708_v20 = vpop.f32.mrf.mxu1 }
 0xb3a   : > { %v2380_v21 = vsel %vm2379_vm7, %v2374_v19, -inf }
 0xb3b   : > { %2381 = vmax.xlane.f32.xlu0 %v2380_v21  ;;  %v2376_v22 = vpop.f32.mrf.mxu1 }
 0xb3d   : > { %v2709_v24 = vpop.f32.mrf.mxu1 }
 0xbc4   : > { %v2382_v25 = vpop.xlane.xlu0 %2381 }
 0xbc5   : > { %v2383_v26 = vsub.f32 %v2374_v19, %v2382_v25 }
 0xbc7   : > { %v2384_v27 = vmul.f32 1.442695, %v2383_v26 }
 0xbc9   : > { %2790 = vpow2.f32 %v2384_v27 }
 0xbd6   : > { %v2791_v28 = vpop.eup %2790 }
 0xbd7   : > { %v2386_v29 = vsel %vm2379_vm7, %v2791_v28, 0.0 }
 0xbd8   : > { %2387 = vadd.xlane.f32.xlu1 %v2386_v29 }
 0xc61   : > { %v2388_v30 = vpop.xlane.xlu1 %2387 }
 0xc62   : > { %2792 = vrcp.f32 %v2388_v30 }
 0xc6f   : > { %v2793_v31 = vpop.eup %2792 }
 0xc70   : > { %v2390_v32 = vmul.f32 %v2793_v31, %v2791_v28 }
 0xc72   : > { %2391 = vst.msk [vmem:[%s594_s29] sm:$0x1] %vm2379_vm7, %v2390_v32 }
 0xc73   : > { %2807 = shalt.err (!%p2804_p3)
}
 0xc74   : > { %s2808_s20 = scalar_lea.hbm %s2403_s24, 16  ;;  %s2812_s29 = scalar_lea.hbm %s3839_s19, 32 }
 0xc75   : > { %p2809_p4 = scmp.ne.s32.totalorder %s2403_s24, %s2808_s20  ;;  %p2813_p9 = scmp.lt.s32.totalorder %s2403_s24, %s3839_s19 }
 0xc76   : > { %p2814_p10 = scmp.lt.s32.totalorder %s2812_s29, %s2808_s20 }
 0xc77   : > { %p2810_p7 = pnand %p2809_p4, %p3006_p5 }
 0xc78   : > { %p2815_p11 = por %p2814_p10, %p2813_p9 }
 0xc79   : > { %p2811_p8 = pneg %p2810_p7 }
 0xc7b   : > { %p2816_p12 = pnand %p2815_p11, %p2811_p8 }
 0xc7d   : > { %2819 = shalt.err (!%p2816_p12)
}
 0xc7e   : > { %2711 = dma.vmem_to_hbm [thread:$0]  (%p3006_p5), %s2406_s5, 16, %s2403_s24, %s2393_s27  }
 0xc7f PF: > { %p2717_p13 = scmp.ge.s32.totalorder %s2854_s21, 2  ;;  %s2417_s6 = sand.u32 1, %s2842_s0  }
 0xc80   : > { %s2418_s28 = scalar_lea.sflag [#allocation5], %s2417_s6 }
 0xc81   : > { %p2714_p0 = pnand %p2717_p13, %p3010_p6 }
 0xc83   : > { %p2715_p1 = pneg %p2714_p0 }
 0xc85   : > { %2837 = dma.done.wait (%p2715_p1), %s2418_s28, 16  }
 0xc86   : > { %2839 = vsyncadd (%p2715_p1), %s2418_s28, 4294967280  ;;  %s3891_s21 = sld [smem:[#allocation8_spill]]  ;;  %s3894_s0 = smov %s2846_s30 }
 0xc87   : > { %s3892_s7 = sld [smem:[#allocation7_spill]] }
 0xc88   : > { %s3893_s20 = sld [smem:[#allocation9_spill]] }
 0xc8c   : > { %p29_p2 = scmp.ge.s32.totalorder %s3891_s21, 4  }
 0xc8d   : > { %s3895_s30 = smov %s3892_s7 }
 0xc8e   :  { %31 = sbr.rel (!%p29_p2) target bundleno = 12 (0xc), region = 148 }
 0xc93   :  { %2422 = vsyncpa [#allocation5], 1 }
 0xc94   :  { %2424 = vsyncpa [#allocation5 + $0x1], 1 }

</bundles_post_ra>
